<compile_context>
chip_gen: v6e
topology: v6e:2x2x1
jax: 0.10.0
libtpu: 0.0.40
codegen_flags: <defaults>
</compile_context>

<pallas_src>
import functools

import jax
import jax.numpy as jnp
from jax.experimental import pallas as pl
from jax.experimental.pallas import tpu as pltpu

EPS = 1e-5            # nn.BatchNorm2d default eps
LANE = 128            # lane width / MXU alignment
MAX_TM = 512          # rows of the im2col matrix per grid step (~85% of roofline)
VMEM_BUDGET = 12 << 20  # keep working set under every chip's default scoped VMEM


def _ru(x, m):
    return (x + m - 1) // m * m


def _pick_tm(m, kp_max, cp):
    """Largest row tile (multiple of 8) whose double-buffered working set fits."""
    tm = max(8, min(MAX_TM, _ru(m, 8)))
    while tm > 8:
        need = (2 * tm * kp_max * 2      # streamed cols tile, bf16, double buffered
                + kp_max * cp * 2        # resident weight block, bf16
                + 2 * tm * cp * 2        # bf16 conv-output tile, double buffered
                + 2 * 2 * cp * 4)        # per-tile stats, f32, double buffered
        if need <= VMEM_BUDGET:
            break
        tm = max(8, _ru(tm // 2, 8))
    return tm


# ---------------------------------------------------------------------------
# Kernel 1: tiled conv matmul + per-tile BN partial statistics
# ---------------------------------------------------------------------------
def _matmul_stats_kernel(cols_ref, w_ref, y_ref, stats_ref):
    # (TM, Kp) bf16 @ (Kp, Cp) bf16 -> f32 accumulation on the MXU
    y = jnp.dot(cols_ref[...], w_ref[...], preferred_element_type=jnp.float32)
    y_ref[...] = y.astype(y_ref.dtype)
    # per-tile, per-channel partial sums for the batch-norm statistics, taken
    # from the f32 accumulator (zero-padded rows contribute exactly 0, so the
    # host-side reduce over tiles is exact)
    stats_ref[0:1, :] = jnp.sum(y, axis=0, keepdims=True)
    stats_ref[1:2, :] = jnp.sum(y * y, axis=0, keepdims=True)


def _conv_matmul_stats(cols, w_mat, tm):
    """cols (M, K) @ w_mat (K, Cout) -> padded (Mp, Cp) bf16 conv output and a
    (2, Cp) [sum, sum-of-squares] per-channel f32 reduction over the true M rows."""
    m, k = cols.shape
    cout = w_mat.shape[1]
    kp, cp, mp = _ru(k, LANE), _ru(cout, LANE), _ru(m, tm)
    nt = mp // tm

    cols_p = jnp.pad(cols.astype(jnp.bfloat16), ((0, mp - m), (0, kp - k)))
    w_p = jnp.pad(w_mat.astype(jnp.bfloat16), ((0, kp - k), (0, cp - cout)))

    y, stats = pl.pallas_call(
        _matmul_stats_kernel,
        out_shape=(jax.ShapeDtypeStruct((mp, cp), jnp.bfloat16),
                   jax.ShapeDtypeStruct((nt, 2, cp), jnp.float32)),
        grid_spec=pltpu.PrefetchScalarGridSpec(
            num_scalar_prefetch=0,
            grid=(nt,),
            in_specs=[
                pl.BlockSpec((tm, kp), lambda i: (i, 0)),   # streamed cols tile
                pl.BlockSpec((kp, cp), lambda i: (0, 0)),   # resident weights
            ],
            out_specs=(
                pl.BlockSpec((tm, cp), lambda i: (i, 0)),
                pl.BlockSpec((None, 2, cp), lambda i: (i, 0, 0)),
            ),
        ),
        compiler_params=pltpu.CompilerParams(
            dimension_semantics=("parallel",)),
    )(cols_p, w_p)
    return y, jnp.sum(stats, axis=0)


def _bn_scale_shift(stats, m_true, gamma, beta):
    """Fold training-mode BatchNorm into a per-channel y*scale + shift."""
    cp = stats.shape[1]
    mean = stats[0] / m_true
    var = jnp.maximum(stats[1] / m_true - mean * mean, 0.0)   # biased variance
    g = jnp.pad(gamma.astype(jnp.float32), (0, cp - gamma.shape[0]),
                constant_values=1.0)
    b = jnp.pad(beta.astype(jnp.float32), (0, cp - beta.shape[0]))
    scale = g * jax.lax.rsqrt(var + EPS)
    shift = b - mean * scale
    return scale.reshape(1, cp), shift.reshape(1, cp)


# ---------------------------------------------------------------------------
# Kernel 2: element-wise BN apply (+ optional ReLU)
# ---------------------------------------------------------------------------
def _bn_act_kernel(y_ref, scale_ref, shift_ref, out_ref, *, relu):
    out = y_ref[...].astype(jnp.float32) * scale_ref[...] + shift_ref[...]
    if relu:
        out = jnp.maximum(out, 0.0)
    out_ref[...] = out.astype(out_ref.dtype)


def _bn_apply(y, scale, shift, *, relu, out_dtype, tm):
    mp, cp = y.shape
    nt = mp // tm
    tile = pl.BlockSpec((tm, cp), lambda i: (i, 0))
    vec = pl.BlockSpec((1, cp), lambda i: (0, 0))
    return pl.pallas_call(
        functools.partial(_bn_act_kernel, relu=relu),
        out_shape=jax.ShapeDtypeStruct((mp, cp), out_dtype),
        grid_spec=pltpu.PrefetchScalarGridSpec(
            num_scalar_prefetch=0, grid=(nt,),
            in_specs=[tile, vec, vec],
            out_specs=pl.BlockSpec((tm, cp), lambda i: (i, 0))),
        compiler_params=pltpu.CompilerParams(
            dimension_semantics=("parallel",)),
    )(y, scale, shift)


# ---------------------------------------------------------------------------
# Kernel 3: fused bn2 + shortcut-bn + residual add + ReLU
# ---------------------------------------------------------------------------
def _bn_add_relu_kernel(y_ref, res_ref, sc_ref, sh_ref, sc_s_ref, sh_s_ref,
                        out_ref):
    main = y_ref[...].astype(jnp.float32) * sc_ref[...] + sh_ref[...]
    short = res_ref[...].astype(jnp.float32) * sc_s_ref[...] + sh_s_ref[...]
    out_ref[...] = jnp.maximum(main + short, 0.0).astype(out_ref.dtype)


def _bn_add_relu(y, res, scale, shift, scale_s, shift_s, *, tm):
    mp, cp = y.shape
    nt = mp // tm
    tile = pl.BlockSpec((tm, cp), lambda i: (i, 0))
    vec = pl.BlockSpec((1, cp), lambda i: (0, 0))
    return pl.pallas_call(
        _bn_add_relu_kernel,
        out_shape=jax.ShapeDtypeStruct((mp, cp), jnp.float32),
        grid_spec=pltpu.PrefetchScalarGridSpec(
            num_scalar_prefetch=0, grid=(nt,),
            in_specs=[tile, tile, vec, vec, vec, vec],
            out_specs=pl.BlockSpec((tm, cp), lambda i: (i, 0))),
        compiler_params=pltpu.CompilerParams(
            dimension_semantics=("parallel",)),
    )(y, res, scale, shift, scale_s, shift_s)


# ---------------------------------------------------------------------------
# JAX glue: im2col / weight reshape (TODO(synk): fuse 3x3 gather in-kernel)
# ---------------------------------------------------------------------------
def _im2col(x_nhwc, ksize, stride, padding):
    n, h, w, c = x_nhwc.shape
    xp = jnp.pad(x_nhwc, ((0, 0), (padding, padding), (padding, padding), (0, 0)))
    ho = (h + 2 * padding - ksize) // stride + 1
    wo = (w + 2 * padding - ksize) // stride + 1
    taps = []
    for ki in range(ksize):
        for kj in range(ksize):
            taps.append(xp[:, ki:ki + (ho - 1) * stride + 1:stride,
                            kj:kj + (wo - 1) * stride + 1:stride, :])
    cols = jnp.stack(taps, axis=3)                      # (N, Ho, Wo, k*k, C)
    return cols.reshape(n * ho * wo, ksize * ksize * c), ho, wo


def _w_to_mat(w_oihw):
    """PyTorch conv weight (Cout,Cin,kh,kw) -> (kh*kw*Cin, Cout), im2col tap order."""
    cout, cin, kh, kw = w_oihw.shape
    return jnp.transpose(w_oihw, (2, 3, 1, 0)).reshape(kh * kw * cin, cout)


# ---------------------------------------------------------------------------
# Parameters (same shapes as the PyTorch module)
# ---------------------------------------------------------------------------
def init_params(key, in_channels, out_channels, stride):
    ks = jax.random.split(key, 6)

    def conv_w(k, cout, cin, ksz):
        bound = 1.0 / (cin * ksz * ksz) ** 0.5
        return jax.random.uniform(k, (cout, cin, ksz, ksz), jnp.float32, -bound, bound)

    def conv_b(k, cout, cin, ksz):
        bound = 1.0 / (cin * ksz * ksz) ** 0.5
        return jax.random.uniform(k, (cout,), jnp.float32, -bound, bound)

    # NOTE: the conv biases are kept for parameter parity with nn.Conv2d but are
    # mathematically cancelled by the training-mode BatchNorm that follows them.
    params = {
        "w1": conv_w(ks[0], out_channels, in_channels, 3),
        "b1": conv_b(ks[1], out_channels, in_channels, 3),
        "g1": jnp.ones((out_channels,), jnp.float32),
        "be1": jnp.zeros((out_channels,), jnp.float32),
        "w2": conv_w(ks[2], out_channels, out_channels, 3),
        "b2": conv_b(ks[3], out_channels, out_channels, 3),
        "g2": jnp.ones((out_channels,), jnp.float32),
        "be2": jnp.zeros((out_channels,), jnp.float32),
    }
    if stride != 1 or in_channels != out_channels:
        params["ws"] = conv_w(ks[4], out_channels, in_channels, 1)
        params["bs"] = conv_b(ks[5], out_channels, in_channels, 1)
        params["gs"] = jnp.ones((out_channels,), jnp.float32)
        params["bes"] = jnp.zeros((out_channels,), jnp.float32)
    return params


# ---------------------------------------------------------------------------
# Forward pass
# ---------------------------------------------------------------------------
@functools.partial(jax.jit, static_argnames=("stride",))
def residual_block_forward(x_nchw, params, stride=1):
    # NHWC, bf16 for everything that streams through HBM (MXU operands are
    # bf16 regardless; BN statistics stay f32 inside the matmul kernel).
    x = jnp.transpose(x_nchw, (0, 2, 3, 1)).astype(jnp.bfloat16)
    n, h, w, cin = x.shape
    cout = params["w1"].shape[0]
    cp = _ru(cout, LANE)

    ho = (h + 2 - 3) // stride + 1
    wo = (w + 2 - 3) // stride + 1
    m = n * ho * wo
    kp_max = _ru(9 * max(cin, cout), LANE)
    tm = _pick_tm(m, kp_max, cp)
    mp = _ru(m, tm)

    # conv1 (3x3, stride, pad 1) + bn1 + relu
    cols1, ho, wo = _im2col(x, 3, stride, 1)
    y1, stats1 = _conv_matmul_stats(cols1, _w_to_mat(params["w1"]), tm)
    scale1, shift1 = _bn_scale_shift(stats1, m, params["g1"], params["be1"])
    out1 = _bn_apply(y1, scale1, shift1, relu=True, out_dtype=jnp.bfloat16, tm=tm)
    out1_nhwc = out1[:m, :cout].reshape(n, ho, wo, cout)

    # shortcut: identity, or 1x1 conv (stride) whose BN is folded into the
    # final fused kernel. The 1x1 conv reads the strided input directly.
    if "ws" in params:
        xs = x[:, ::stride, ::stride, :].reshape(m, cin)
        res, stats_s = _conv_matmul_stats(xs, _w_to_mat(params["ws"]), tm)
        scale_s, shift_s = _bn_scale_shift(stats_s, m, params["gs"], params["bes"])
    else:
        res = jnp.pad(x.reshape(m, cin), ((0, mp - m), (0, cp - cin)))
        scale_s = jnp.ones((1, cp), jnp.float32)
        shift_s = jnp.zeros((1, cp), jnp.float32)

    # conv2 (3x3, stride 1, pad 1) + bn2 + shortcut-bn + residual add + relu
    cols2, _, _ = _im2col(out1_nhwc, 3, 1, 1)
    y2, stats2 = _conv_matmul_stats(cols2, _w_to_mat(params["w2"]), tm)
    scale2, shift2 = _bn_scale_shift(stats2, m, params["g2"], params["be2"])
    out = _bn_add_relu(y2, res, scale2, shift2, scale_s, shift_s, tm=tm)

    out = out[:m, :cout].reshape(n, ho, wo, cout)
    return jnp.transpose(out, (0, 3, 1, 2))                       # back to NCHW


# ---------------------------------------------------------------------------
# Pure-JAX/XLA f32 reference (for a structural correctness check)
# ---------------------------------------------------------------------------
def _reference_forward(x_nchw, params, stride):
    x = jnp.transpose(x_nchw, (0, 2, 3, 1)).astype(jnp.float32)

    def conv(inp, wgt, bias, s, pad):
        w_hwio = jnp.transpose(wgt, (2, 3, 1, 0))
        y = jax.lax.conv_general_dilated(
            inp, w_hwio, window_strides=(s, s),
            padding=[(pad, pad), (pad, pad)],
            dimension_numbers=("NHWC", "HWIO", "NHWC"))
        return y + bias.reshape(1, 1, 1, -1)

    def bn(y, gamma, beta):
        mean = jnp.mean(y, axis=(0, 1, 2), keepdims=True)
        var = jnp.mean(jnp.square(y - mean), axis=(0, 1, 2), keepdims=True)
        return ((y - mean) * jax.lax.rsqrt(var + EPS)
                * gamma.reshape(1, 1, 1, -1) + beta.reshape(1, 1, 1, -1))

    out = jnp.maximum(bn(conv(x, params["w1"], params["b1"], stride, 1),
                         params["g1"], params["be1"]), 0.0)
    out = bn(conv(out, params["w2"], params["b2"], 1, 1),
             params["g2"], params["be2"])
    if "ws" in params:
        sc = bn(conv(x, params["ws"], params["bs"], stride, 0),
                params["gs"], params["bes"])
    else:
        sc = x
    out = jnp.maximum(out + sc, 0.0)
    return jnp.transpose(out, (0, 3, 1, 2))


if __name__ == "__main__":
    key = jax.random.PRNGKey(0)
    kx, kp = jax.random.split(key)
    n, cin, hgt, wid = 2, 4, 16, 16
    cout, stride = 8, 1   # cin != cout -> shortcut uses the 1x1 conv + BN branch
    x = jax.random.normal(kx, (n, cin, hgt, wid), dtype=jnp.float32)
    params = init_params(kp, cin, cout, stride)

    y = residual_block_forward(x, params, stride=stride)
    y = jax.block_until_ready(y)

    assert y.shape == (n, cout, hgt // stride, wid // stride)
    assert bool(jnp.all(jnp.isfinite(y)))

    # structural check vs. a pure f32 XLA reference (loose tolerance: the
    # Pallas path streams bf16 operands/intermediates per the perf design).
    y_ref = _reference_forward(x, params, stride)
    max_err = float(jnp.max(jnp.abs(y - y_ref)))
    assert max_err < 0.25, f"max abs err vs reference: {max_err}"

    print("KERNEL_OK")
</pallas_src>

<mosaic_0001>
module attributes {stable_mosaic.version = 11 : i64} {
  func.func @_matmul_stats_kernel(%arg0: i32, %arg1: memref<512x128xbf16, #tpu.memory_space<vmem>>, %arg2: memref<128x128xbf16, #tpu.memory_space<vmem>>, %arg3: memref<512x128xbf16, #tpu.memory_space<vmem>>, %arg4: memref<1x2x128xf32, #tpu.memory_space<vmem>>) attributes {dimension_semantics = [#tpu.dimension_semantics<parallel>], iteration_bounds = array<i64: 1>, scalar_prefetch = 0 : i64, scratch_operands = 0 : i64, tpu.core_type = #tpu.core_type<tc>, window_params = [{transform_indices = @transform_0, window_bounds = array<i64: 512, 128>}, {pipeline_mode = #tpu.pipeline_mode<synchronous>, transform_indices = @transform_1, window_bounds = array<i64: 128, 128>}, {transform_indices = @transform_2, window_bounds = array<i64: 512, 128>}, {transform_indices = @transform_3, window_bounds = array<i64: 1, 2, 128>}]} {
    %c0 = arith.constant 0 : index
    %c0_0 = arith.constant 0 : index
    %0 = vector.load %arg1[%c0, %c0_0] : memref<512x128xbf16, #tpu.memory_space<vmem>>, vector<512x128xbf16>
    %c0_1 = arith.constant 0 : index
    %c0_2 = arith.constant 0 : index
    %1 = vector.load %arg2[%c0_1, %c0_2] : memref<128x128xbf16, #tpu.memory_space<vmem>>, vector<128x128xbf16>
    %cst = arith.constant dense<0.000000e+00> : vector<512x128xf32>
    %2 = tpu.matmul %0, %1, %cst {dimension_numbers = #tpu.dot_dimension_numbers<[1], [0], [0], [1], [0, 0, 1, 1], [], []>} : vector<512x128xbf16>, vector<128x128xbf16>, vector<512x128xf32> -> vector<512x128xf32>
    %3 = arith.truncf %2 : vector<512x128xf32> to vector<512x128xbf16>
    %c0_3 = arith.constant 0 : index
    %c0_4 = arith.constant 0 : index
    %4 = vector.load %arg3[%c0_3, %c0_4] : memref<512x128xbf16, #tpu.memory_space<vmem>>, vector<512x128xbf16>
    tpu.vector_store %arg3[%c0_3, %c0_4], %3 {strides = array<i32>} : memref<512x128xbf16, #tpu.memory_space<vmem>>, vector<512x128xbf16>,
    %cst_5 = arith.constant dense<0.000000e+00> : vector<128xf32>
    %5 = vector.multi_reduction <add>, %2, %cst_5 [0] : vector<512x128xf32> to vector<128xf32>
    %6 = vector.shape_cast %5 : vector<128xf32> to vector<1x128xf32>
    %c0_6 = arith.constant 0 : index
    %c0_7 = arith.constant 0 : index
    %c0_8 = arith.constant 0 : index
    %7 = vector.load %arg4[%c0_6, %c0_7, %c0_8] : memref<1x2x128xf32, #tpu.memory_space<vmem>>, vector<1x1x128xf32>
    %8 = vector.shape_cast %7 : vector<1x1x128xf32> to vector<1x128xf32>
    %9 = vector.shape_cast %6 : vector<1x128xf32> to vector<1x1x128xf32>
    tpu.vector_store %arg4[%c0_6, %c0_7, %c0_8], %9 {strides = array<i32>} : memref<1x2x128xf32, #tpu.memory_space<vmem>>, vector<1x1x128xf32>,
    %10 = arith.mulf %2, %2 : vector<512x128xf32>
    %cst_9 = arith.constant dense<0.000000e+00> : vector<128xf32>
    %11 = vector.multi_reduction <add>, %10, %cst_9 [0] : vector<512x128xf32> to vector<128xf32>
    %12 = vector.shape_cast %11 : vector<128xf32> to vector<1x128xf32>
    %c0_10 = arith.constant 0 : index
    %c1 = arith.constant 1 : index
    %c0_11 = arith.constant 0 : index
    %13 = vector.load %arg4[%c0_10, %c1, %c0_11] : memref<1x2x128xf32, #tpu.memory_space<vmem>>, vector<1x1x128xf32>
    %14 = vector.shape_cast %13 : vector<1x1x128xf32> to vector<1x128xf32>
    %15 = vector.shape_cast %12 : vector<1x128xf32> to vector<1x1x128xf32>
    tpu.vector_store %arg4[%c0_10, %c1, %c0_11], %15 {strides = array<i32>} : memref<1x2x128xf32, #tpu.memory_space<vmem>>, vector<1x1x128xf32>,
    return
  }
  func.func @transform_0(%arg0: i32) -> (i32, i32) {
    %c0_i32 = arith.constant 0 : i32
    %c0_i32_0 = arith.constant 0 : i32
    return %arg0, %c0_i32 : i32, i32
  }
  func.func @transform_1(%arg0: i32) -> (i32, i32) {
    %c0_i32 = arith.constant 0 : i32
    %c0_i32_0 = arith.constant 0 : i32
    %c0_i32_1 = arith.constant 0 : i32
    return %c0_i32, %c0_i32_0 : i32, i32
  }
  func.func @transform_2(%arg0: i32) -> (i32, i32) {
    %c0_i32 = arith.constant 0 : i32
    %c0_i32_0 = arith.constant 0 : i32
    return %arg0, %c0_i32 : i32, i32
  }
  func.func @transform_3(%arg0: i32) -> (i32, i32, i32) {
    %c0_i32 = arith.constant 0 : i32
    %c0_i32_0 = arith.constant 0 : i32
    %c0_i32_1 = arith.constant 0 : i32
    return %arg0, %c0_i32, %c0_i32_0 : i32, i32, i32
  }
}

module attributes {stable_mosaic.version = 11 : i64} {
  func.func @_bn_act_kernel(%arg0: i32, %arg1: memref<512x128xbf16, #tpu.memory_space<vmem>>, %arg2: memref<1x128xf32, #tpu.memory_space<vmem>>, %arg3: memref<1x128xf32, #tpu.memory_space<vmem>>, %arg4: memref<512x128xbf16, #tpu.memory_space<vmem>>) attributes {dimension_semantics = [#tpu.dimension_semantics<parallel>], iteration_bounds = array<i64: 1>, scalar_prefetch = 0 : i64, scratch_operands = 0 : i64, tpu.core_type = #tpu.core_type<tc>, window_params = [{transform_indices = @transform_0, window_bounds = array<i64: 512, 128>}, {pipeline_mode = #tpu.pipeline_mode<synchronous>, transform_indices = @transform_1, window_bounds = array<i64: 1, 128>}, {pipeline_mode = #tpu.pipeline_mode<synchronous>, transform_indices = @transform_2, window_bounds = array<i64: 1, 128>}, {transform_indices = @transform_3, window_bounds = array<i64: 512, 128>}]} {
    %c0 = arith.constant 0 : index
    %c0_0 = arith.constant 0 : index
    %0 = vector.load %arg1[%c0, %c0_0] : memref<512x128xbf16, #tpu.memory_space<vmem>>, vector<512x128xbf16>
    %1 = arith.extf %0 : vector<512x128xbf16> to vector<512x128xf32>
    %c0_1 = arith.constant 0 : index
    %c0_2 = arith.constant 0 : index
    %2 = vector.load %arg2[%c0_1, %c0_2] : memref<1x128xf32, #tpu.memory_space<vmem>>, vector<1x128xf32>
    %3 = vector.broadcast %2 : vector<1x128xf32> to vector<512x128xf32>
    %4 = arith.mulf %1, %3 : vector<512x128xf32>
    %c0_3 = arith.constant 0 : index
    %c0_4 = arith.constant 0 : index
    %5 = vector.load %arg3[%c0_3, %c0_4] : memref<1x128xf32, #tpu.memory_space<vmem>>, vector<1x128xf32>
    %6 = vector.broadcast %5 : vector<1x128xf32> to vector<512x128xf32>
    %7 = arith.addf %4, %6 : vector<512x128xf32>
    %cst = arith.constant 0.000000e+00 : f32
    %8 = vector.broadcast %cst : f32 to vector<512x128xf32>
    %9 = arith.maximumf %7, %8 : vector<512x128xf32>
    %10 = arith.truncf %9 : vector<512x128xf32> to vector<512x128xbf16>
    %c0_5 = arith.constant 0 : index
    %c0_6 = arith.constant 0 : index
    %11 = vector.load %arg4[%c0_5, %c0_6] : memref<512x128xbf16, #tpu.memory_space<vmem>>, vector<512x128xbf16>
    tpu.vector_store %arg4[%c0_5, %c0_6], %10 {strides = array<i32>} : memref<512x128xbf16, #tpu.memory_space<vmem>>, vector<512x128xbf16>,
    return
  }
  func.func @transform_0(%arg0: i32) -> (i32, i32) {
    %c0_i32 = arith.constant 0 : i32
    %c0_i32_0 = arith.constant 0 : i32
    return %arg0, %c0_i32 : i32, i32
  }
  func.func @transform_1(%arg0: i32) -> (i32, i32) {
    %c0_i32 = arith.constant 0 : i32
    %c0_i32_0 = arith.constant 0 : i32
    %c0_i32_1 = arith.constant 0 : i32
    return %c0_i32, %c0_i32_0 : i32, i32
  }
  func.func @transform_2(%arg0: i32) -> (i32, i32) {
    %c0_i32 = arith.constant 0 : i32
    %c0_i32_0 = arith.constant 0 : i32
    %c0_i32_1 = arith.constant 0 : i32
    return %c0_i32, %c0_i32_0 : i32, i32
  }
  func.func @transform_3(%arg0: i32) -> (i32, i32) {
    %c0_i32 = arith.constant 0 : i32
    %c0_i32_0 = arith.constant 0 : i32
    return %arg0, %c0_i32 : i32, i32
  }
}

module attributes {stable_mosaic.version = 11 : i64} {
  func.func @_bn_add_relu_kernel(%arg0: i32, %arg1: memref<512x128xbf16, #tpu.memory_space<vmem>>, %arg2: memref<512x128xbf16, #tpu.memory_space<vmem>>, %arg3: memref<1x128xf32, #tpu.memory_space<vmem>>, %arg4: memref<1x128xf32, #tpu.memory_space<vmem>>, %arg5: memref<1x128xf32, #tpu.memory_space<vmem>>, %arg6: memref<1x128xf32, #tpu.memory_space<vmem>>, %arg7: memref<512x128xf32, #tpu.memory_space<vmem>>) attributes {dimension_semantics = [#tpu.dimension_semantics<parallel>], iteration_bounds = array<i64: 1>, scalar_prefetch = 0 : i64, scratch_operands = 0 : i64, tpu.core_type = #tpu.core_type<tc>, window_params = [{transform_indices = @transform_0, window_bounds = array<i64: 512, 128>}, {transform_indices = @transform_1, window_bounds = array<i64: 512, 128>}, {pipeline_mode = #tpu.pipeline_mode<synchronous>, transform_indices = @transform_2, window_bounds = array<i64: 1, 128>}, {pipeline_mode = #tpu.pipeline_mode<synchronous>, transform_indices = @transform_3, window_bounds = array<i64: 1, 128>}, {pipeline_mode = #tpu.pipeline_mode<synchronous>, transform_indices = @transform_4, window_bounds = array<i64: 1, 128>}, {pipeline_mode = #tpu.pipeline_mode<synchronous>, transform_indices = @transform_5, window_bounds = array<i64: 1, 128>}, {transform_indices = @transform_6, window_bounds = array<i64: 512, 128>}]} {
    %c0 = arith.constant 0 : index
    %c0_0 = arith.constant 0 : index
    %0 = vector.load %arg1[%c0, %c0_0] : memref<512x128xbf16, #tpu.memory_space<vmem>>, vector<512x128xbf16>
    %1 = arith.extf %0 : vector<512x128xbf16> to vector<512x128xf32>
    %c0_1 = arith.constant 0 : index
    %c0_2 = arith.constant 0 : index
    %2 = vector.load %arg3[%c0_1, %c0_2] : memref<1x128xf32, #tpu.memory_space<vmem>>, vector<1x128xf32>
    %3 = vector.broadcast %2 : vector<1x128xf32> to vector<512x128xf32>
    %4 = arith.mulf %1, %3 : vector<512x128xf32>
    %c0_3 = arith.constant 0 : index
    %c0_4 = arith.constant 0 : index
    %5 = vector.load %arg4[%c0_3, %c0_4] : memref<1x128xf32, #tpu.memory_space<vmem>>, vector<1x128xf32>
    %6 = vector.broadcast %5 : vector<1x128xf32> to vector<512x128xf32>
    %7 = arith.addf %4, %6 : vector<512x128xf32>
    %c0_5 = arith.constant 0 : index
    %c0_6 = arith.constant 0 : index
    %8 = vector.load %arg2[%c0_5, %c0_6] : memref<512x128xbf16, #tpu.memory_space<vmem>>, vector<512x128xbf16>
    %9 = arith.extf %8 : vector<512x128xbf16> to vector<512x128xf32>
    %c0_7 = arith.constant 0 : index
    %c0_8 = arith.constant 0 : index
    %10 = vector.load %arg5[%c0_7, %c0_8] : memref<1x128xf32, #tpu.memory_space<vmem>>, vector<1x128xf32>
    %11 = vector.broadcast %10 : vector<1x128xf32> to vector<512x128xf32>
    %12 = arith.mulf %9, %11 : vector<512x128xf32>
    %c0_9 = arith.constant 0 : index
    %c0_10 = arith.constant 0 : index
    %13 = vector.load %arg6[%c0_9, %c0_10] : memref<1x128xf32, #tpu.memory_space<vmem>>, vector<1x128xf32>
    %14 = vector.broadcast %13 : vector<1x128xf32> to vector<512x128xf32>
    %15 = arith.addf %12, %14 : vector<512x128xf32>
    %16 = arith.addf %7, %15 : vector<512x128xf32>
    %cst = arith.constant 0.000000e+00 : f32
    %17 = vector.broadcast %cst : f32 to vector<512x128xf32>
    %18 = arith.maximumf %16, %17 : vector<512x128xf32>
    %c0_11 = arith.constant 0 : index
    %c0_12 = arith.constant 0 : index
    %19 = vector.load %arg7[%c0_11, %c0_12] : memref<512x128xf32, #tpu.memory_space<vmem>>, vector<512x128xf32>
    tpu.vector_store %arg7[%c0_11, %c0_12], %18 {strides = array<i32>} : memref<512x128xf32, #tpu.memory_space<vmem>>, vector<512x128xf32>,
    return
  }
  func.func @transform_0(%arg0: i32) -> (i32, i32) {
    %c0_i32 = arith.constant 0 : i32
    %c0_i32_0 = arith.constant 0 : i32
    return %arg0, %c0_i32 : i32, i32
  }
  func.func @transform_1(%arg0: i32) -> (i32, i32) {
    %c0_i32 = arith.constant 0 : i32
    %c0_i32_0 = arith.constant 0 : i32
    return %arg0, %c0_i32 : i32, i32
  }
  func.func @transform_2(%arg0: i32) -> (i32, i32) {
    %c0_i32 = arith.constant 0 : i32
    %c0_i32_0 = arith.constant 0 : i32
    %c0_i32_1 = arith.constant 0 : i32
    return %c0_i32, %c0_i32_0 : i32, i32
  }
  func.func @transform_3(%arg0: i32) -> (i32, i32) {
    %c0_i32 = arith.constant 0 : i32
    %c0_i32_0 = arith.constant 0 : i32
    %c0_i32_1 = arith.constant 0 : i32
    return %c0_i32, %c0_i32_0 : i32, i32
  }
  func.func @transform_4(%arg0: i32) -> (i32, i32) {
    %c0_i32 = arith.constant 0 : i32
    %c0_i32_0 = arith.constant 0 : i32
    %c0_i32_1 = arith.constant 0 : i32
    return %c0_i32, %c0_i32_0 : i32, i32
  }
  func.func @transform_5(%arg0: i32) -> (i32, i32) {
    %c0_i32 = arith.constant 0 : i32
    %c0_i32_0 = arith.constant 0 : i32
    %c0_i32_1 = arith.constant 0 : i32
    return %c0_i32, %c0_i32_0 : i32, i32
  }
  func.func @transform_6(%arg0: i32) -> (i32, i32) {
    %c0_i32 = arith.constant 0 : i32
    %c0_i32_0 = arith.constant 0 : i32
    return %arg0, %c0_i32 : i32, i32
  }
}

</mosaic_0001>

<bundles_post_ra>
// kernel: residual_block_forward.6
= control target key start
LH: loop header
LB: loop body
LE: loop exit
PB: predicated region body
PF: predicated region fallthrough
CT: control target
= control target key end

     0   :  { %s1502_s0 = inlined_call_operand.vmem [shape: bf16[512,128], index: 0, kind: input, shape index: {}]   ;;  %s1503_s1 = inlined_call_operand.vmem [shape: f32[1,128], index: 1, kind: input, shape index: {}]   ;;  %s1504_s2 = inlined_call_operand.vmem [shape: f32[1,128], index: 2, kind: input, shape index: {}]   ;;  %s1505_s3 = inlined_call_operand.vmem [shape: bf16[512,128], index: 3, kind: output, shape index: {}]  }
   0x1   :  { %v803_v0 = vld [vmem:[%s1502_s0] sm:$0xff]   ;;  %v1090_v4 = vld [vmem:[%s1502_s0 + $0x8] sm:$0xff]   ;;  %v1091_v5 = vld [vmem:[%s1502_s0 + $0x10] sm:$0xff]  }
   0x2   :  { %v1178_v1 = vld [vmem:[%s1503_s1] ss:$0 sm:$0xff]  ;;  %v804_v2 = vunpack.c.l.bf16 %v803_v0  ;;  %v805_v3 = vunpack.c.h.bf16 %v803_v0  ;;  %v1092_v6 = vld [vmem:[%s1502_s0 + $0x18] sm:$0xff]   ;;  %v808_v8 = vunpack.c.l.bf16 %v1090_v4  ;;  %v809_v9 = vunpack.c.h.bf16 %v1090_v4  ;;  %v1094_v33 = vld [vmem:[%s1502_s0 + $0x28] sm:$0xff]  }
   0x3   :  { %v1192_v7 = vld [vmem:[%s1504_s2] ss:$0 sm:$0xff]  ;;  %v812_v10 = vunpack.c.l.bf16 %v1091_v5  ;;  %v813_v11 = vunpack.c.h.bf16 %v1091_v5  ;;  %v816_v14 = vunpack.c.l.bf16 %v1092_v6  ;;  %v817_v15 = vunpack.c.h.bf16 %v1092_v6  ;;  %v1095_v38 = vld [vmem:[%s1502_s0 + $0x30] sm:$0xff]   ;;  %v1096_v43 = vld [vmem:[%s1502_s0 + $0x38] sm:$0xff]  }
   0x4   :  { %v149_v12 = vmul.f32 %v804_v2, %v1178_v1  ;;  %v150_v13 = vmul.f32 %v805_v3, %v1178_v1  ;;  %v151_v16 = vmul.f32 %v808_v8, %v1178_v1  ;;  %v152_v17 = vmul.f32 %v809_v9, %v1178_v1  ;;  %v1093_v28 = vld [vmem:[%s1502_s0 + $0x20] sm:$0xff]  }
   0x5   :  { %v153_v18 = vmul.f32 %v812_v10, %v1178_v1  ;;  %v154_v19 = vmul.f32 %v813_v11, %v1178_v1  ;;  %v155_v22 = vmul.f32 %v816_v14, %v1178_v1  ;;  %v156_v23 = vmul.f32 %v817_v15, %v1178_v1  ;;  %v1097_v0 = vld [vmem:[%s1502_s0 + $0x40] sm:$0xff]   ;;  %v1098_v11 = vld [vmem:[%s1502_s0 + $0x48] sm:$0xff]  }
   0x6   :  { %v220_v20 = vadd.f32 %v1192_v7, %v149_v12  ;;  %v221_v21 = vadd.f32 %v1192_v7, %v150_v13  ;;  %v222_v24 = vadd.f32 %v1192_v7, %v151_v16  ;;  %v223_v25 = vadd.f32 %v1192_v7, %v152_v17  ;;  %v1099_v16 = vld [vmem:[%s1502_s0 + $0x50] sm:$0xff]  }
   0x7   :  { %v224_v26 = vadd.f32 %v1192_v7, %v153_v18  ;;  %v225_v27 = vadd.f32 %v1192_v7, %v154_v19  ;;  %v226_v31 = vadd.f32 %v1192_v7, %v155_v22  ;;  %v227_v32 = vadd.f32 %v1192_v7, %v156_v23 }
   0x8   :  { %v284_v29 = vmax.f32 %v220_v20, 0.0  ;;  %v285_v30 = vmax.f32 %v221_v21, 0.0  ;;  %v286_v34 = vmax.f32 %v222_v24, 0.0  ;;  %v287_v35 = vmax.f32 %v223_v25, 0.0  ;;  %v1100_v25 = vld [vmem:[%s1502_s0 + $0x58] sm:$0xff]  }
   0x9   :  { %v288_v36 = vmax.f32 %v224_v26, 0.0  ;;  %v289_v37 = vmax.f32 %v225_v27, 0.0  ;;  %v290_v40 = vmax.f32 %v226_v31, 0.0  ;;  %v291_v41 = vmax.f32 %v227_v32, 0.0 }
   0xa   :  { %v933_v39 = vpack.c.bf16 %v285_v30, %v284_v29  ;;  %v820_v42 = vunpack.c.l.bf16 %v1093_v28  ;;  %v938_v44 = vpack.c.bf16 %v287_v35, %v286_v34  ;;  %v821_v46 = vunpack.c.h.bf16 %v1093_v28 }
   0xb   :  { %v943_v45 = vpack.c.bf16 %v289_v37, %v288_v36  ;;  %v824_v47 = vunpack.c.l.bf16 %v1094_v33  ;;  %v948_v48 = vpack.c.bf16 %v291_v41, %v290_v40  ;;  %v825_v50 = vunpack.c.h.bf16 %v1094_v33 }
   0xc   :  { %934 = vst [vmem:[%s1505_s3] sm:$0xff] %v933_v39   ;;  %v157_v49 = vmul.f32 %v820_v42, %v1178_v1  ;;  %v828_v51 = vunpack.c.l.bf16 %v1095_v38  ;;  %1121 = vst [vmem:[%s1505_s3 + $0x8] sm:$0xff] %v938_v44   ;;  %v158_v52 = vmul.f32 %v821_v46, %v1178_v1  ;;  %v829_v54 = vunpack.c.h.bf16 %v1095_v38  ;;  %v1101_v38 = vld [vmem:[%s1502_s0 + $0x60] sm:$0xff]  }
   0xd   :  { %1122 = vst [vmem:[%s1505_s3 + $0x10] sm:$0xff] %v943_v45   ;;  %v159_v53 = vmul.f32 %v824_v47, %v1178_v1  ;;  %v832_v55 = vunpack.c.l.bf16 %v1096_v43  ;;  %1123 = vst [vmem:[%s1505_s3 + $0x18] sm:$0xff] %v948_v48   ;;  %v160_v57 = vmul.f32 %v825_v50, %v1178_v1  ;;  %v833_v59 = vunpack.c.h.bf16 %v1096_v43 }
   0xe   :  { %v228_v56 = vadd.f32 %v1192_v7, %v157_v49  ;;  %v161_v58 = vmul.f32 %v828_v51, %v1178_v1  ;;  %v229_v60 = vadd.f32 %v1192_v7, %v158_v52  ;;  %v162_v62 = vmul.f32 %v829_v54, %v1178_v1  ;;  %v1102_v51 = vld [vmem:[%s1502_s0 + $0x68] sm:$0xff]  }
   0xf   :  { %v230_v61 = vadd.f32 %v1192_v7, %v159_v53  ;;  %v163_v63 = vmul.f32 %v832_v55, %v1178_v1  ;;  %v231_v3 = vadd.f32 %v1192_v7, %v160_v57  ;;  %v164_v5 = vmul.f32 %v833_v59, %v1178_v1 }
  0x10   :  { %v292_v2 = vmax.f32 %v228_v56, 0.0  ;;  %v232_v4 = vadd.f32 %v1192_v7, %v161_v58  ;;  %v293_v6 = vmax.f32 %v229_v60, 0.0  ;;  %v233_v9 = vadd.f32 %v1192_v7, %v162_v62  ;;  %v1103_v60 = vld [vmem:[%s1502_s0 + $0x70] sm:$0xff]  }
  0x11   :  { %v294_v8 = vmax.f32 %v230_v61, 0.0  ;;  %v234_v10 = vadd.f32 %v1192_v7, %v163_v63  ;;  %v295_v12 = vmax.f32 %v231_v3, 0.0  ;;  %v235_v14 = vadd.f32 %v1192_v7, %v164_v5 }
  0x12   :  { %v296_v13 = vmax.f32 %v232_v4, 0.0  ;;  %v836_v15 = vunpack.c.l.bf16 %v1097_v0  ;;  %v953_v17 = vpack.c.bf16 %v293_v6, %v292_v2  ;;  %v297_v18 = vmax.f32 %v233_v9, 0.0  ;;  %v1104_v2 = vld [vmem:[%s1502_s0 + $0x78] sm:$0xff]  }
  0x13   :  { %v298_v19 = vmax.f32 %v234_v10, 0.0  ;;  %v837_v20 = vunpack.c.h.bf16 %v1097_v0  ;;  %v958_v21 = vpack.c.bf16 %v295_v12, %v294_v8  ;;  %v299_v22 = vmax.f32 %v235_v14, 0.0  ;;  %v1105_v12 = vld [vmem:[%s1502_s0 + $0x80] sm:$0xff]  }
  0x14   :  { %v165_v23 = vmul.f32 %v836_v15, %v1178_v1  ;;  %v840_v24 = vunpack.c.l.bf16 %v1098_v11  ;;  %1124 = vst [vmem:[%s1505_s3 + $0x20] sm:$0xff] %v953_v17   ;;  %v963_v26 = vpack.c.bf16 %v297_v18, %v296_v13  ;;  %v841_v28 = vunpack.c.h.bf16 %v1098_v11 }
  0x15   :  { %v166_v27 = vmul.f32 %v837_v20, %v1178_v1  ;;  %v844_v29 = vunpack.c.l.bf16 %v1099_v16  ;;  %1125 = vst [vmem:[%s1505_s3 + $0x28] sm:$0xff] %v958_v21   ;;  %v968_v30 = vpack.c.bf16 %v299_v22, %v298_v19  ;;  %v845_v33 = vunpack.c.h.bf16 %v1099_v16 }
  0x16   :  { %v236_v31 = vadd.f32 %v1192_v7, %v165_v23  ;;  %v167_v32 = vmul.f32 %v840_v24, %v1178_v1  ;;  %1126 = vst [vmem:[%s1505_s3 + $0x30] sm:$0xff] %v963_v26   ;;  %v168_v35 = vmul.f32 %v841_v28, %v1178_v1  ;;  %v848_v37 = vunpack.c.l.bf16 %v1100_v25 }
  0x17   :  { %v237_v34 = vadd.f32 %v1192_v7, %v166_v27  ;;  %v169_v36 = vmul.f32 %v844_v29, %v1178_v1  ;;  %1127 = vst [vmem:[%s1505_s3 + $0x38] sm:$0xff] %v968_v30   ;;  %v170_v41 = vmul.f32 %v845_v33, %v1178_v1  ;;  %v849_v42 = vunpack.c.h.bf16 %v1100_v25  ;;  %v1106_v29 = vld [vmem:[%s1502_s0 + $0x88] sm:$0xff]  }
  0x18   :  { %v300_v39 = vmax.f32 %v236_v31, 0.0  ;;  %v238_v40 = vadd.f32 %v1192_v7, %v167_v32  ;;  %v239_v44 = vadd.f32 %v1192_v7, %v168_v35  ;;  %v171_v46 = vmul.f32 %v848_v37, %v1178_v1 }
  0x19   :  { %v301_v43 = vmax.f32 %v237_v34, 0.0  ;;  %v240_v45 = vadd.f32 %v1192_v7, %v169_v36  ;;  %v241_v48 = vadd.f32 %v1192_v7, %v170_v41  ;;  %v172_v49 = vmul.f32 %v849_v42, %v1178_v1  ;;  %v1107_v34 = vld [vmem:[%s1502_s0 + $0x90] sm:$0xff]  }
  0x1a   :  { %v302_v47 = vmax.f32 %v238_v40, 0.0  ;;  %v852_v50 = vunpack.c.l.bf16 %v1101_v38  ;;  %v303_v53 = vmax.f32 %v239_v44, 0.0  ;;  %v242_v55 = vadd.f32 %v1192_v7, %v171_v46 }
  0x1b   :  { %v973_v52 = vpack.c.bf16 %v301_v43, %v300_v39  ;;  %v304_v54 = vmax.f32 %v240_v45, 0.0  ;;  %v305_v56 = vmax.f32 %v241_v48, 0.0  ;;  %v243_v57 = vadd.f32 %v1192_v7, %v172_v49  ;;  %v1108_v43 = vld [vmem:[%s1502_s0 + $0x98] sm:$0xff]  }
  0x1c   :  { %v853_v58 = vunpack.c.h.bf16 %v1101_v38  ;;  %v173_v59 = vmul.f32 %v852_v50, %v1178_v1  ;;  %v978_v61 = vpack.c.bf16 %v303_v53, %v302_v47  ;;  %v306_v62 = vmax.f32 %v242_v55, 0.0 }
  0x1d   :  { %1128 = vst [vmem:[%s1505_s3 + $0x40] sm:$0xff] %v973_v52   ;;  %v856_v63 = vunpack.c.l.bf16 %v1102_v51  ;;  %v857_v0 = vunpack.c.h.bf16 %v1102_v51  ;;  %v983_v3 = vpack.c.bf16 %v305_v56, %v304_v54  ;;  %v307_v4 = vmax.f32 %v243_v57, 0.0  ;;  %v1109_v56 = vld [vmem:[%s1502_s0 + $0xa0] sm:$0xff]  }
  0x1e   :  { %v174_v5 = vmul.f32 %v853_v58, %v1178_v1  ;;  %v244_v6 = vadd.f32 %v1192_v7, %v173_v59  ;;  %1129 = vst [vmem:[%s1505_s3 + $0x48] sm:$0xff] %v978_v61   ;;  %v860_v10 = vunpack.c.l.bf16 %v1103_v60  ;;  %v861_v11 = vunpack.c.h.bf16 %v1103_v60 }
  0x1f   :  { %v175_v8 = vmul.f32 %v856_v63, %v1178_v1  ;;  %v176_v9 = vmul.f32 %v857_v0, %v1178_v1  ;;  %1130 = vst [vmem:[%s1505_s3 + $0x50] sm:$0xff] %v983_v3   ;;  %v988_v13 = vpack.c.bf16 %v307_v4, %v306_v62  ;;  %v864_v16 = vunpack.c.l.bf16 %v1104_v2 }
  0x20   :  { %v245_v14 = vadd.f32 %v1192_v7, %v174_v5  ;;  %v308_v15 = vmax.f32 %v244_v6, 0.0  ;;  %v177_v19 = vmul.f32 %v860_v10, %v1178_v1  ;;  %v178_v20 = vmul.f32 %v861_v11, %v1178_v1 }
  0x21   :  { %v246_v17 = vadd.f32 %v1192_v7, %v175_v8  ;;  %v247_v18 = vadd.f32 %v1192_v7, %v176_v9  ;;  %1131 = vst [vmem:[%s1505_s3 + $0x58] sm:$0xff] %v988_v13   ;;  %v865_v22 = vunpack.c.h.bf16 %v1104_v2  ;;  %v179_v23 = vmul.f32 %v864_v16, %v1178_v1  ;;  %v1110_v2 = vld [vmem:[%s1502_s0 + $0xa8] sm:$0xff]   ;;  %v1111_v16 = vld [vmem:[%s1502_s0 + $0xb0] sm:$0xff]  }
  0x22   :  { %v309_v21 = vmax.f32 %v245_v14, 0.0  ;;  %v868_v24 = vunpack.c.l.bf16 %v1105_v12  ;;  %v248_v27 = vadd.f32 %v1192_v7, %v177_v19  ;;  %v249_v28 = vadd.f32 %v1192_v7, %v178_v20 }
  0x23   :  { %v310_v25 = vmax.f32 %v246_v17, 0.0  ;;  %v311_v26 = vmax.f32 %v247_v18, 0.0  ;;  %v180_v31 = vmul.f32 %v865_v22, %v1178_v1  ;;  %v250_v32 = vadd.f32 %v1192_v7, %v179_v23 }
  0x24   :  { %v993_v30 = vpack.c.bf16 %v309_v21, %v308_v15  ;;  %v869_v33 = vunpack.c.h.bf16 %v1105_v12  ;;  %v312_v36 = vmax.f32 %v248_v27, 0.0  ;;  %v313_v37 = vmax.f32 %v249_v28, 0.0  ;;  %v1112_v21 = vld [vmem:[%s1502_s0 + $0xb8] sm:$0xff]  }
  0x25   :  { %v998_v35 = vpack.c.bf16 %v311_v26, %v310_v25  ;;  %v181_v38 = vmul.f32 %v868_v24, %v1178_v1  ;;  %v251_v39 = vadd.f32 %v1192_v7, %v180_v31  ;;  %v314_v40 = vmax.f32 %v250_v32, 0.0 }
  0x26   :  { %1132 = vst [vmem:[%s1505_s3 + $0x60] sm:$0xff] %v993_v30   ;;  %v182_v41 = vmul.f32 %v869_v33, %v1178_v1  ;;  %v872_v42 = vunpack.c.l.bf16 %v1106_v29  ;;  %v1003_v44 = vpack.c.bf16 %v313_v37, %v312_v36  ;;  %v873_v46 = vunpack.c.h.bf16 %v1106_v29 }
  0x27   :  { %1133 = vst [vmem:[%s1505_s3 + $0x68] sm:$0xff] %v998_v35   ;;  %v252_v45 = vadd.f32 %v1192_v7, %v181_v38  ;;  %v876_v47 = vunpack.c.l.bf16 %v1107_v34  ;;  %v315_v48 = vmax.f32 %v251_v39, 0.0  ;;  %v877_v51 = vunpack.c.h.bf16 %v1107_v34  ;;  %v1113_v34 = vld [vmem:[%s1502_s0 + $0xc0] sm:$0xff]  }
  0x28   :  { %v253_v49 = vadd.f32 %v1192_v7, %v182_v41  ;;  %v183_v50 = vmul.f32 %v872_v42, %v1178_v1  ;;  %1134 = vst [vmem:[%s1505_s3 + $0x70] sm:$0xff] %v1003_v44   ;;  %v184_v53 = vmul.f32 %v873_v46, %v1178_v1  ;;  %v880_v55 = vunpack.c.l.bf16 %v1108_v43 }
  0x29   :  { %v316_v52 = vmax.f32 %v252_v45, 0.0  ;;  %v185_v54 = vmul.f32 %v876_v47, %v1178_v1  ;;  %v1008_v57 = vpack.c.bf16 %v315_v48, %v314_v40  ;;  %v186_v60 = vmul.f32 %v877_v51, %v1178_v1  ;;  %v1114_v47 = vld [vmem:[%s1502_s0 + $0xc8] sm:$0xff]  }
  0x2a   :  { %v317_v58 = vmax.f32 %v253_v49, 0.0  ;;  %v254_v59 = vadd.f32 %v1192_v7, %v183_v50  ;;  %v255_v61 = vadd.f32 %v1192_v7, %v184_v53  ;;  %v881_v63 = vunpack.c.h.bf16 %v1108_v43 }
  0x2b   :  { %v256_v62 = vadd.f32 %v1192_v7, %v185_v54  ;;  %v187_v0 = vmul.f32 %v880_v55, %v1178_v1  ;;  %1135 = vst [vmem:[%s1505_s3 + $0x78] sm:$0xff] %v1008_v57   ;;  %v257_v5 = vadd.f32 %v1192_v7, %v186_v60  ;;  %v884_v6 = vunpack.c.l.bf16 %v1109_v56 }
  0x2c   :  { %v1013_v3 = vpack.c.bf16 %v317_v58, %v316_v52  ;;  %v318_v4 = vmax.f32 %v254_v59, 0.0  ;;  %v319_v8 = vmax.f32 %v255_v61, 0.0  ;;  %v188_v10 = vmul.f32 %v881_v63, %v1178_v1  ;;  %v1115_v52 = vld [vmem:[%s1502_s0 + $0xd0] sm:$0xff]   ;;  %v1116_v61 = vld [vmem:[%s1502_s0 + $0xd8] sm:$0xff]  }
  0x2d   :  { %v320_v9 = vmax.f32 %v256_v62, 0.0  ;;  %v258_v11 = vadd.f32 %v1192_v7, %v187_v0  ;;  %v321_v12 = vmax.f32 %v257_v5, 0.0  ;;  %v885_v13 = vunpack.c.h.bf16 %v1109_v56 }
  0x2e   :  { %1136 = vst [vmem:[%s1505_s3 + $0x80] sm:$0xff] %v1013_v3   ;;  %v189_v14 = vmul.f32 %v884_v6, %v1178_v1  ;;  %v888_v15 = vunpack.c.l.bf16 %v1110_v2  ;;  %v1018_v17 = vpack.c.bf16 %v319_v8, %v318_v4  ;;  %v259_v18 = vadd.f32 %v1192_v7, %v188_v10 }
  0x2f   :  { %v322_v19 = vmax.f32 %v258_v11, 0.0  ;;  %v889_v20 = vunpack.c.h.bf16 %v1110_v2  ;;  %v1023_v22 = vpack.c.bf16 %v321_v12, %v320_v9  ;;  %v190_v23 = vmul.f32 %v885_v13, %v1178_v1  ;;  %v1117_v12 = vld [vmem:[%s1502_s0 + $0xe0] sm:$0xff]  }
  0x30   :  { %v260_v24 = vadd.f32 %v1192_v7, %v189_v14  ;;  %v191_v25 = vmul.f32 %v888_v15, %v1178_v1  ;;  %1137 = vst [vmem:[%s1505_s3 + $0x88] sm:$0xff] %v1018_v17   ;;  %v323_v26 = vmax.f32 %v259_v18, 0.0  ;;  %v892_v28 = vunpack.c.l.bf16 %v1111_v16 }
  0x31   :  { %v192_v27 = vmul.f32 %v889_v20, %v1178_v1  ;;  %v893_v29 = vunpack.c.h.bf16 %v1111_v16  ;;  %1138 = vst [vmem:[%s1505_s3 + $0x90] sm:$0xff] %v1023_v22   ;;  %v261_v30 = vadd.f32 %v1192_v7, %v190_v23  ;;  %v896_v33 = vunpack.c.l.bf16 %v1112_v21 }
  0x32   :  { %v324_v31 = vmax.f32 %v260_v24, 0.0  ;;  %v262_v32 = vadd.f32 %v1192_v7, %v191_v25  ;;  %v1028_v35 = vpack.c.bf16 %v323_v26, %v322_v19  ;;  %v193_v37 = vmul.f32 %v892_v28, %v1178_v1 }
  0x33   :  { %v263_v36 = vadd.f32 %v1192_v7, %v192_v27  ;;  %v194_v38 = vmul.f32 %v893_v29, %v1178_v1  ;;  %v325_v39 = vmax.f32 %v261_v30, 0.0  ;;  %v897_v41 = vunpack.c.h.bf16 %v1112_v21  ;;  %v1118_v21 = vld [vmem:[%s1502_s0 + $0xe8] sm:$0xff]  }
  0x34   :  { %v326_v40 = vmax.f32 %v262_v32, 0.0  ;;  %v195_v42 = vmul.f32 %v896_v33, %v1178_v1  ;;  %1139 = vst [vmem:[%s1505_s3 + $0x98] sm:$0xff] %v1028_v35   ;;  %v264_v44 = vadd.f32 %v1192_v7, %v193_v37  ;;  %v900_v46 = vunpack.c.l.bf16 %v1113_v34 }
  0x35   :  { %v327_v43 = vmax.f32 %v263_v36, 0.0  ;;  %v265_v45 = vadd.f32 %v1192_v7, %v194_v38  ;;  %v1033_v48 = vpack.c.bf16 %v325_v39, %v324_v31  ;;  %v196_v49 = vmul.f32 %v897_v41, %v1178_v1  ;;  %v1120_v39 = vld [vmem:[%s1502_s0 + $0xf8] sm:$0xff]  }
  0x36   :  { %v266_v50 = vadd.f32 %v1192_v7, %v195_v42  ;;  %v901_v51 = vunpack.c.h.bf16 %v1113_v34  ;;  %v328_v54 = vmax.f32 %v264_v44, 0.0  ;;  %v197_v56 = vmul.f32 %v900_v46, %v1178_v1  ;;  %v1119_v34 = vld [vmem:[%s1502_s0 + $0xf0] sm:$0xff]  }
  0x37   :  { %v1038_v53 = vpack.c.bf16 %v327_v43, %v326_v40  ;;  %v329_v55 = vmax.f32 %v265_v45, 0.0  ;;  %1140 = vst [vmem:[%s1505_s3 + $0xa0] sm:$0xff] %v1033_v48   ;;  %v267_v57 = vadd.f32 %v1192_v7, %v196_v49  ;;  %v904_v60 = vunpack.c.l.bf16 %v1114_v47 }
  0x38   :  { %v330_v58 = vmax.f32 %v266_v50, 0.0  ;;  %v198_v59 = vmul.f32 %v901_v51, %v1178_v1  ;;  %v268_v63 = vadd.f32 %v1192_v7, %v197_v56  ;;  %v905_v0 = vunpack.c.h.bf16 %v1114_v47 }
  0x39   :  { %1141 = vst [vmem:[%s1505_s3 + $0xa8] sm:$0xff] %v1038_v53   ;;  %v1043_v62 = vpack.c.bf16 %v329_v55, %v328_v54  ;;  %v908_v2 = vunpack.c.l.bf16 %v1115_v52  ;;  %v331_v3 = vmax.f32 %v267_v57, 0.0  ;;  %v199_v5 = vmul.f32 %v904_v60, %v1178_v1 }
  0x3a   :  { %v269_v4 = vadd.f32 %v1192_v7, %v198_v59  ;;  %v909_v6 = vunpack.c.h.bf16 %v1115_v52  ;;  %v332_v8 = vmax.f32 %v268_v63, 0.0  ;;  %v200_v9 = vmul.f32 %v905_v0, %v1178_v1 }
  0x3b   :  { %1142 = vst [vmem:[%s1505_s3 + $0xb0] sm:$0xff] %v1043_v62   ;;  %v201_v10 = vmul.f32 %v908_v2, %v1178_v1  ;;  %v912_v11 = vunpack.c.l.bf16 %v1116_v61  ;;  %v1048_v13 = vpack.c.bf16 %v331_v3, %v330_v58  ;;  %v270_v15 = vadd.f32 %v1192_v7, %v199_v5 }
  0x3c   :  { %v333_v14 = vmax.f32 %v269_v4, 0.0  ;;  %v202_v16 = vmul.f32 %v909_v6, %v1178_v1  ;;  %v271_v17 = vadd.f32 %v1192_v7, %v200_v9  ;;  %v913_v19 = vunpack.c.h.bf16 %v1116_v61 }
  0x3d   :  { %v272_v18 = vadd.f32 %v1192_v7, %v201_v10  ;;  %v203_v20 = vmul.f32 %v912_v11, %v1178_v1  ;;  %1143 = vst [vmem:[%s1505_s3 + $0xb8] sm:$0xff] %v1048_v13   ;;  %v334_v23 = vmax.f32 %v270_v15, 0.0  ;;  %v916_v25 = vunpack.c.l.bf16 %v1117_v12 }
  0x3e   :  { %v1053_v22 = vpack.c.bf16 %v333_v14, %v332_v8  ;;  %v273_v24 = vadd.f32 %v1192_v7, %v202_v16  ;;  %v335_v26 = vmax.f32 %v271_v17, 0.0  ;;  %v204_v28 = vmul.f32 %v913_v19, %v1178_v1 }
  0x3f   :  { %v336_v27 = vmax.f32 %v272_v18, 0.0  ;;  %v274_v29 = vadd.f32 %v1192_v7, %v203_v20  ;;  %v917_v31 = vunpack.c.h.bf16 %v1117_v12  ;;  %v205_v32 = vmul.f32 %v916_v25, %v1178_v1 }
  0x40   :  { %1144 = vst [vmem:[%s1505_s3 + $0xc0] sm:$0xff] %v1053_v22   ;;  %v337_v30 = vmax.f32 %v273_v24, 0.0  ;;  %v920_v33 = vunpack.c.l.bf16 %v1118_v21  ;;  %v1058_v35 = vpack.c.bf16 %v335_v26, %v334_v23  ;;  %v275_v36 = vadd.f32 %v1192_v7, %v204_v28 }
  0x41   :  { %v338_v37 = vmax.f32 %v274_v29, 0.0  ;;  %v921_v38 = vunpack.c.h.bf16 %v1118_v21  ;;  %v206_v41 = vmul.f32 %v917_v31, %v1178_v1  ;;  %v276_v42 = vadd.f32 %v1192_v7, %v205_v32 }
  0x42   :  { %v1063_v40 = vpack.c.bf16 %v337_v30, %v336_v27  ;;  %v207_v43 = vmul.f32 %v920_v33, %v1178_v1  ;;  %1145 = vst [vmem:[%s1505_s3 + $0xc8] sm:$0xff] %v1058_v35   ;;  %v339_v44 = vmax.f32 %v275_v36, 0.0  ;;  %v924_v46 = vunpack.c.l.bf16 %v1119_v34 }
  0x43   :  { %v208_v45 = vmul.f32 %v921_v38, %v1178_v1  ;;  %v925_v47 = vunpack.c.h.bf16 %v1119_v34  ;;  %v277_v48 = vadd.f32 %v1192_v7, %v206_v41  ;;  %v340_v49 = vmax.f32 %v276_v42, 0.0 }
  0x44   :  { %1146 = vst [vmem:[%s1505_s3 + $0xd0] sm:$0xff] %v1063_v40   ;;  %v278_v50 = vadd.f32 %v1192_v7, %v207_v43  ;;  %v928_v51 = vunpack.c.l.bf16 %v1120_v39  ;;  %v1068_v52 = vpack.c.bf16 %v339_v44, %v338_v37  ;;  %v209_v54 = vmul.f32 %v924_v46, %v1178_v1 }
  0x45   :  { %v279_v53 = vadd.f32 %v1192_v7, %v208_v45  ;;  %v210_v55 = vmul.f32 %v925_v47, %v1178_v1  ;;  %v341_v56 = vmax.f32 %v277_v48, 0.0  ;;  %v929_v58 = vunpack.c.h.bf16 %v1120_v39 }
  0x46   :  { %v342_v57 = vmax.f32 %v278_v50, 0.0  ;;  %v211_v59 = vmul.f32 %v928_v51, %v1178_v1  ;;  %1147 = vst [vmem:[%s1505_s3 + $0xd8] sm:$0xff] %v1068_v52   ;;  %v280_v61 = vadd.f32 %v1192_v7, %v209_v54 }
  0x47   :  { %v343_v60 = vmax.f32 %v279_v53, 0.0  ;;  %v281_v62 = vadd.f32 %v1192_v7, %v210_v55  ;;  %v1073_v63 = vpack.c.bf16 %v341_v56, %v340_v49  ;;  %v212_v0 = vmul.f32 %v929_v58, %v1178_v1 }
  0x48   :  { %v282_v2 = vadd.f32 %v1192_v7, %v211_v59  ;;  %v344_v4 = vmax.f32 %v280_v61, 0.0 }
  0x49   :  { %v1078_v3 = vpack.c.bf16 %v343_v60, %v342_v57  ;;  %v345_v5 = vmax.f32 %v281_v62, 0.0  ;;  %1148 = vst [vmem:[%s1505_s3 + $0xe0] sm:$0xff] %v1073_v63   ;;  %v283_v6 = vadd.f32 %v1192_v7, %v212_v0 }
  0x4a   :  { %v346_v8 = vmax.f32 %v282_v2, 0.0 }
  0x4b   :  { %1149 = vst [vmem:[%s1505_s3 + $0xe8] sm:$0xff] %v1078_v3   ;;  %v1083_v9 = vpack.c.bf16 %v345_v5, %v344_v4  ;;  %v347_v10 = vmax.f32 %v283_v6, 0.0 }
  0x4d   :  { %1150 = vst [vmem:[%s1505_s3 + $0xf0] sm:$0xff] %v1083_v9   ;;  %v1088_v1 = vpack.c.bf16 %v347_v10, %v346_v8 }
  0x4f   :  { %1151 = vst [vmem:[%s1505_s3 + $0xf8] sm:$0xff] %v1088_v1  }

// kernel: residual_block_forward.5
= control target key start
LH: loop header
LB: loop body
LE: loop exit
PB: predicated region body
PF: predicated region fallthrough
CT: control target
= control target key end

     0   :  { %s2124_s1 = inlined_call_operand.vmem [shape: bf16[128,128], index: 1, kind: input, shape index: {}]   ;;  %s2125_s0 = inlined_call_operand.vmem [shape: bf16[512,128], index: 0, kind: input, shape index: {}]   ;;  %s2126_s2 = inlined_call_operand.vmem [shape: bf16[512,128], index: 2, kind: output, shape index: {0}]   ;;  %s2127_s3 = inlined_call_operand.vmem [shape: f32[1,2,128], index: 3, kind: output, shape index: {1}]  }
   0x1   :  { %v1650_v0 = vld [vmem:[%s2124_s1 + $0x38] sm:$0xff]   ;;  %v1651_v1 = vld [vmem:[%s2124_s1 + $0x30] sm:$0xff]   ;;  %v1652_v2 = vld [vmem:[%s2124_s1 + $0x28] sm:$0xff]  }
   0x2   :  { %1554 = vmatprep.subr.bf16.mxu0 %v1650_v0  ;;  %1634 = vmatprep.subr.bf16.mxu1 %v1650_v0  ;;  %v1653_v3 = vld [vmem:[%s2124_s1 + $0x20] sm:$0xff]   ;;  %v1654_v5 = vld [vmem:[%s2124_s1 + $0x18] sm:$0xff]   ;;  %v1655_v6 = vld [vmem:[%s2124_s1 + $0x10] sm:$0xff]  }
   0x3   :  { %1555 = vmatpush3.bf16.msra.mxu0 %v1650_v0  ;;  %1642 = vmatpush3.bf16.msra.mxu1 %v1650_v0  ;;  %v1658_v4 = vld [vmem:[%s2125_s0] sm:$0xff]   ;;  %v1656_v7 = vld [vmem:[%s2124_s1 + $0x8] sm:$0xff]   ;;  %v1660_v11 = vld [vmem:[%s2125_s0 + $0x10] sm:$0xff]  }
   0x4   :  { %1556 = vmatprep.subr.bf16.mxu0 %v1651_v1  ;;  %1635 = vmatprep.subr.bf16.mxu1 %v1651_v1  ;;  %v1657_v8 = vld [vmem:[%s2124_s1] sm:$0xff]   ;;  %v1659_v10 = vld [vmem:[%s2125_s0 + $0x8] sm:$0xff]   ;;  %v1676_v13 = vld [vmem:[%s2125_s0 + $0x90] sm:$0xff]  }
   0x5   :  { %1570 = vmatprep.mubr.bf16.mxu0 %v1658_v4  ;;  %v1674_v9 = vld [vmem:[%s2125_s0 + $0x80] sm:$0xff]   ;;  %v1675_v12 = vld [vmem:[%s2125_s0 + $0x88] sm:$0xff]   ;;  %v1661_v14 = vld [vmem:[%s2125_s0 + $0x18] sm:$0xff]  }
   0x6   :  { %1602 = vmatprep.mubr.bf16.mxu1 %v1674_v9  ;;  %v1662_v15 = vld [vmem:[%s2125_s0 + $0x20] sm:$0xff]   ;;  %v1677_v16 = vld [vmem:[%s2125_s0 + $0x98] sm:$0xff]   ;;  %v1663_v18 = vld [vmem:[%s2125_s0 + $0x28] sm:$0xff]  }
   0x7   :  { %1557 = vmatpush3.bf16.msra.mxu0 %v1651_v1  ;;  %1643 = vmatpush3.bf16.msra.mxu1 %v1651_v1  ;;  %v1678_v17 = vld [vmem:[%s2125_s0 + $0xa0] sm:$0xff]   ;;  %v1679_v19 = vld [vmem:[%s2125_s0 + $0xa8] sm:$0xff]   ;;  %v1664_v20 = vld [vmem:[%s2125_s0 + $0x30] sm:$0xff]  }
   0x8   :  { %1558 = vmatprep.subr.bf16.mxu0 %v1652_v2  ;;  %1636 = vmatprep.subr.bf16.mxu1 %v1652_v2  ;;  %v1680_v21 = vld [vmem:[%s2125_s0 + $0xb0] sm:$0xff]   ;;  %v1665_v22 = vld [vmem:[%s2125_s0 + $0x38] sm:$0xff]   ;;  %v1666_v24 = vld [vmem:[%s2125_s0 + $0x40] sm:$0xff]  }
   0x9   :  { %v1681_v23 = vld [vmem:[%s2125_s0 + $0xb8] sm:$0xff]   ;;  %v1682_v25 = vld [vmem:[%s2125_s0 + $0xc0] sm:$0xff]   ;;  %v1667_v26 = vld [vmem:[%s2125_s0 + $0x48] sm:$0xff]  }
   0xa   :  { %v1683_v27 = vld [vmem:[%s2125_s0 + $0xc8] sm:$0xff]   ;;  %v1668_v28 = vld [vmem:[%s2125_s0 + $0x50] sm:$0xff]   ;;  %v1669_v30 = vld [vmem:[%s2125_s0 + $0x58] sm:$0xff]  }
   0xb   :  { %1559 = vmatpush3.bf16.msra.mxu0 %v1652_v2  ;;  %1644 = vmatpush3.bf16.msra.mxu1 %v1652_v2  ;;  %v1684_v29 = vld [vmem:[%s2125_s0 + $0xd0] sm:$0xff]   ;;  %v1685_v31 = vld [vmem:[%s2125_s0 + $0xd8] sm:$0xff]   ;;  %v1670_v32 = vld [vmem:[%s2125_s0 + $0x60] sm:$0xff]  }
   0xc   :  { %1560 = vmatprep.subr.bf16.mxu0 %v1653_v3  ;;  %1637 = vmatprep.subr.bf16.mxu1 %v1653_v3  ;;  %v1686_v33 = vld [vmem:[%s2125_s0 + $0xe0] sm:$0xff]   ;;  %v1671_v34 = vld [vmem:[%s2125_s0 + $0x68] sm:$0xff]   ;;  %v1672_v36 = vld [vmem:[%s2125_s0 + $0x70] sm:$0xff]  }
   0xd   :  { %v1687_v35 = vld [vmem:[%s2125_s0 + $0xe8] sm:$0xff]   ;;  %v1688_v37 = vld [vmem:[%s2125_s0 + $0xf0] sm:$0xff]   ;;  %v1673_v38 = vld [vmem:[%s2125_s0 + $0x78] sm:$0xff]  }
   0xe   :  { %v1689_v39 = vld [vmem:[%s2125_s0 + $0xf8] sm:$0xff]  }
   0xf   :  { %1561 = vmatpush3.bf16.msra.mxu0 %v1653_v3  ;;  %1645 = vmatpush3.bf16.msra.mxu1 %v1653_v3 }
  0x10   :  { %1562 = vmatprep.subr.bf16.mxu0 %v1654_v5  ;;  %1638 = vmatprep.subr.bf16.mxu1 %v1654_v5 }
  0x13   :  { %1563 = vmatpush3.bf16.msra.mxu0 %v1654_v5  ;;  %1646 = vmatpush3.bf16.msra.mxu1 %v1654_v5 }
  0x14   :  { %1564 = vmatprep.subr.bf16.mxu0 %v1655_v6  ;;  %1639 = vmatprep.subr.bf16.mxu1 %v1655_v6 }
  0x17   :  { %1565 = vmatpush3.bf16.msra.mxu0 %v1655_v6  ;;  %1647 = vmatpush3.bf16.msra.mxu1 %v1655_v6 }
  0x18   :  { %1566 = vmatprep.subr.bf16.mxu0 %v1656_v7  ;;  %1640 = vmatprep.subr.bf16.mxu1 %v1656_v7 }
  0x1b   :  { %1567 = vmatpush3.bf16.msra.mxu0 %v1656_v7  ;;  %1648 = vmatpush3.bf16.msra.mxu1 %v1656_v7 }
  0x1c   :  { %1568 = vmatprep.subr.bf16.mxu0 %v1657_v8  ;;  %1641 = vmatprep.subr.bf16.mxu1 %v1657_v8 }
  0x1f   :  { %1569 = vmatpush3.bf16.msra.mxu0 %v1657_v8  ;;  %1649 = vmatpush3.bf16.msra.mxu1 %v1657_v8 }
  0x22   :  { %1571 = vmatmul.mubr.bf16.vlgmr.msra.gmra.mxu0 %v1659_v10  ;;  %1603 = vmatmul.mubr.bf16.vlgmr.msra.gmra.mxu1 %v1675_v12 }
  0x23   :  { %1574 = vmatprep.mubr.bf16.mxu0 %v1660_v11  ;;  %1606 = vmatprep.mubr.bf16.mxu1 %v1676_v13 }
  0x2a   :  { %1575 = vmatmul.mubr.bf16.gmra.mxu0 %v1661_v14  ;;  %1607 = vmatmul.mubr.bf16.gmra.mxu1 %v1677_v16 }
  0x2b   :  { %1578 = vmatprep.mubr.bf16.mxu0 %v1662_v15  ;;  %1610 = vmatprep.mubr.bf16.mxu1 %v1678_v17 }
  0x32   :  { %1579 = vmatmul.mubr.bf16.gmra.mxu0 %v1663_v18  ;;  %1611 = vmatmul.mubr.bf16.gmra.mxu1 %v1679_v19 }
  0x33   :  { %1582 = vmatprep.mubr.bf16.mxu0 %v1664_v20  ;;  %1614 = vmatprep.mubr.bf16.mxu1 %v1680_v21 }
  0x3a   :  { %1583 = vmatmul.mubr.bf16.gmra.mxu0 %v1665_v22  ;;  %1615 = vmatmul.mubr.bf16.gmra.mxu1 %v1681_v23 }
  0x3b   :  { %1586 = vmatprep.mubr.bf16.mxu0 %v1666_v24  ;;  %1618 = vmatprep.mubr.bf16.mxu1 %v1682_v25 }
  0x42   :  { %1587 = vmatmul.mubr.bf16.gmra.mxu0 %v1667_v26  ;;  %1619 = vmatmul.mubr.bf16.gmra.mxu1 %v1683_v27 }
  0x43   :  { %1590 = vmatprep.mubr.bf16.mxu0 %v1668_v28  ;;  %1622 = vmatprep.mubr.bf16.mxu1 %v1684_v29 }
  0x4a   :  { %1591 = vmatmul.mubr.bf16.gmra.mxu0 %v1669_v30  ;;  %1623 = vmatmul.mubr.bf16.gmra.mxu1 %v1685_v31 }
  0x4b   :  { %1594 = vmatprep.mubr.bf16.mxu0 %v1670_v32  ;;  %1626 = vmatprep.mubr.bf16.mxu1 %v1686_v33 }
  0x52   :  { %1595 = vmatmul.mubr.bf16.gmra.mxu0 %v1671_v34  ;;  %1627 = vmatmul.mubr.bf16.gmra.mxu1 %v1687_v35 }
  0x53   :  { %1598 = vmatprep.mubr.bf16.mxu0 %v1672_v36  ;;  %1630 = vmatprep.mubr.bf16.mxu1 %v1688_v37 }
  0x5a   :  { %1599 = vmatmul.mubr.bf16.gmra.mxu0 %v1673_v38  ;;  %1631 = vmatmul.mubr.bf16.gmra.mxu1 %v1689_v39 }
  0xe2   :  { %v1572_v40 = vpop.f32.mrf.mxu0  ;;  %v1830_v41 = vpop.f32.mrf.mxu1 }
  0xe3   :  { %v1015_v57 = vmul.f32 %v1572_v40, %v1572_v40 }
  0xe4   :  { %v368_v42 = vpop.f32.mrf.mxu0  ;;  %v1832_v43 = vpop.f32.mrf.mxu1 }
  0xe5   :  { %v1013_v48 = vmul.f32 %v368_v42, %v368_v42 }
  0xe6   :  { %v1573_v44 = vpop.f32.mrf.mxu0  ;;  %v1834_v45 = vpop.f32.mrf.mxu1 }
  0xe7   :  { %v1331_v46 = vpack.c.bf16 %v1573_v44, %v1572_v40  ;;  %v1411_v47 = vpack.c.bf16 %v1834_v45, %v1830_v41  ;;  %v1016_v62 = vmul.f32 %v1573_v44, %v1573_v44 }
  0xe8   :  { %v371_v49 = vpop.f32.mrf.mxu0  ;;  %v1838_v50 = vpop.f32.mrf.mxu1 }
  0xe9   :  { %1483 = vst [vmem:[%s2126_s2 + $0x8] sm:$0xff] %v1331_v46   ;;  %v1326_v51 = vpack.c.bf16 %v371_v49, %v368_v42  ;;  %v943_v52 = vadd.f32 %v371_v49, %v368_v42  ;;  %v1014_v53 = vmul.f32 %v371_v49, %v371_v49  ;;  %1499 = vst [vmem:[%s2126_s2 + $0x88] sm:$0xff] %v1411_v47  }
  0xea   :  { %v1406_v54 = vpack.c.bf16 %v1838_v50, %v1832_v43  ;;  %v1576_v55 = vpop.f32.mrf.mxu0  ;;  %v1848_v56 = vpop.f32.mrf.mxu1 }
  0xeb   :  { %1327 = vst [vmem:[%s2126_s2] sm:$0xff] %v1326_v51   ;;  %v944_v58 = vadd.f32 %v1572_v40, %v943_v52  ;;  %v1077_v59 = vadd.f32 %v1014_v53, %v1013_v48  ;;  %v1019_v17 = vmul.f32 %v1576_v55, %v1576_v55 }
  0xec   :  { %1498 = vst [vmem:[%s2126_s2 + $0x80] sm:$0xff] %v1406_v54   ;;  %v384_v60 = vpop.f32.mrf.mxu0  ;;  %v1856_v61 = vpop.f32.mrf.mxu1 }
  0xed   :  { %v1078_v63 = vadd.f32 %v1077_v59, %v1015_v57  ;;  %v945_v0 = vadd.f32 %v1573_v44, %v944_v58  ;;  %v1017_v4 = vmul.f32 %v384_v60, %v384_v60 }
  0xee   :  { %v1577_v1 = vpop.f32.mrf.mxu0  ;;  %v1858_v2 = vpop.f32.mrf.mxu1 }
  0xef   :  { %v946_v3 = vadd.f32 %v945_v0, %v384_v60  ;;  %v1079_v5 = vadd.f32 %v1078_v63, %v1016_v62  ;;  %v1341_v6 = vpack.c.bf16 %v1577_v1, %v1576_v55  ;;  %v1421_v8 = vpack.c.bf16 %v1858_v2, %v1848_v56 }
  0xf0   :  { %v387_v7 = vpop.f32.mrf.mxu0  ;;  %v1862_v9 = vpop.f32.mrf.mxu1  ;;  %v1020_v22 = vmul.f32 %v1577_v1, %v1577_v1 }
  0xf1   :  { %v1080_v10 = vadd.f32 %v1079_v5, %v1017_v4  ;;  %1485 = vst [vmem:[%s2126_s2 + $0x18] sm:$0xff] %v1341_v6   ;;  %v1336_v11 = vpack.c.bf16 %v387_v7, %v384_v60  ;;  %v947_v12 = vadd.f32 %v946_v3, %v387_v7  ;;  %v1018_v13 = vmul.f32 %v387_v7, %v387_v7 }
  0xf2   :  { %v1580_v14 = vpop.f32.mrf.mxu0  ;;  %1501 = vst [vmem:[%s2126_s2 + $0x98] sm:$0xff] %v1421_v8   ;;  %v1416_v15 = vpack.c.bf16 %v1862_v9, %v1856_v61  ;;  %v1872_v16 = vpop.f32.mrf.mxu1 }
  0xf3   :  { %1484 = vst [vmem:[%s2126_s2 + $0x10] sm:$0xff] %v1336_v11   ;;  %v948_v18 = vadd.f32 %v1576_v55, %v947_v12  ;;  %v1081_v19 = vadd.f32 %v1080_v10, %v1018_v13  ;;  %v1023_v42 = vmul.f32 %v1580_v14, %v1580_v14 }
  0xf4   :  { %v400_v20 = vpop.f32.mrf.mxu0  ;;  %1500 = vst [vmem:[%s2126_s2 + $0x90] sm:$0xff] %v1416_v15   ;;  %v1880_v21 = vpop.f32.mrf.mxu1 }
  0xf5   :  { %v1082_v23 = vadd.f32 %v1081_v19, %v1019_v17  ;;  %v949_v24 = vadd.f32 %v1577_v1, %v948_v18  ;;  %v1021_v28 = vmul.f32 %v400_v20, %v400_v20 }
  0xf6   :  { %v1581_v25 = vpop.f32.mrf.mxu0  ;;  %v1882_v26 = vpop.f32.mrf.mxu1 }
  0xf7   :  { %v950_v27 = vadd.f32 %v949_v24, %v400_v20  ;;  %v1083_v29 = vadd.f32 %v1082_v23, %v1020_v22  ;;  %v1351_v30 = vpack.c.bf16 %v1581_v25, %v1580_v14  ;;  %v1431_v32 = vpack.c.bf16 %v1882_v26, %v1872_v16 }
  0xf8   :  { %v403_v31 = vpop.f32.mrf.mxu0  ;;  %v1886_v33 = vpop.f32.mrf.mxu1  ;;  %v1024_v49 = vmul.f32 %v1581_v25, %v1581_v25 }
  0xf9   :  { %v1084_v34 = vadd.f32 %v1083_v29, %v1021_v28  ;;  %1487 = vst [vmem:[%s2126_s2 + $0x28] sm:$0xff] %v1351_v30   ;;  %v1346_v35 = vpack.c.bf16 %v403_v31, %v400_v20  ;;  %v951_v36 = vadd.f32 %v950_v27, %v403_v31  ;;  %v1022_v37 = vmul.f32 %v403_v31, %v403_v31 }
  0xfa   :  { %v1584_v38 = vpop.f32.mrf.mxu0  ;;  %1503 = vst [vmem:[%s2126_s2 + $0xa8] sm:$0xff] %v1431_v32   ;;  %v1426_v39 = vpack.c.bf16 %v1886_v33, %v1880_v21  ;;  %v1896_v40 = vpop.f32.mrf.mxu1 }
  0xfb   :  { %1486 = vst [vmem:[%s2126_s2 + $0x20] sm:$0xff] %v1346_v35   ;;  %v952_v44 = vadd.f32 %v1580_v14, %v951_v36  ;;  %v1085_v46 = vadd.f32 %v1084_v34, %v1022_v37  ;;  %v1027_v8 = vmul.f32 %v1584_v38, %v1584_v38 }
  0xfc   :  { %v416_v47 = vpop.f32.mrf.mxu0  ;;  %1502 = vst [vmem:[%s2126_s2 + $0xa0] sm:$0xff] %v1426_v39   ;;  %v1904_v48 = vpop.f32.mrf.mxu1 }
  0xfd   :  { %v1086_v51 = vadd.f32 %v1085_v46, %v1023_v42  ;;  %v953_v52 = vadd.f32 %v1581_v25, %v952_v44  ;;  %v1025_v57 = vmul.f32 %v416_v47, %v416_v47 }
  0xfe   :  { %v1585_v53 = vpop.f32.mrf.mxu0  ;;  %v1906_v54 = vpop.f32.mrf.mxu1 }
  0xff   :  { %v954_v55 = vadd.f32 %v953_v52, %v416_v47  ;;  %v1087_v58 = vadd.f32 %v1086_v51, %v1024_v49  ;;  %v1361_v59 = vpack.c.bf16 %v1585_v53, %v1584_v38  ;;  %v1441_v62 = vpack.c.bf16 %v1906_v54, %v1896_v40 }
 0x100   :  { %v419_v60 = vpop.f32.mrf.mxu0  ;;  %v1910_v63 = vpop.f32.mrf.mxu1  ;;  %v1028_v14 = vmul.f32 %v1585_v53, %v1585_v53 }
 0x101   :  { %v1088_v0 = vadd.f32 %v1087_v58, %v1025_v57  ;;  %1489 = vst [vmem:[%s2126_s2 + $0x38] sm:$0xff] %v1361_v59   ;;  %v1356_v1 = vpack.c.bf16 %v419_v60, %v416_v47  ;;  %v955_v3 = vadd.f32 %v954_v55, %v419_v60  ;;  %v1026_v4 = vmul.f32 %v419_v60, %v419_v60 }
 0x102   :  { %v1588_v5 = vpop.f32.mrf.mxu0  ;;  %1505 = vst [vmem:[%s2126_s2 + $0xb8] sm:$0xff] %v1441_v62   ;;  %v1436_v6 = vpack.c.bf16 %v1910_v63, %v1904_v48  ;;  %v1920_v7 = vpop.f32.mrf.mxu1 }
 0x103   :  { %1488 = vst [vmem:[%s2126_s2 + $0x30] sm:$0xff] %v1356_v1   ;;  %v956_v10 = vadd.f32 %v1584_v38, %v955_v3  ;;  %v1089_v11 = vadd.f32 %v1088_v0, %v1026_v4  ;;  %v1031_v37 = vmul.f32 %v1588_v5, %v1588_v5 }
 0x104   :  { %v432_v12 = vpop.f32.mrf.mxu0  ;;  %1504 = vst [vmem:[%s2126_s2 + $0xb0] sm:$0xff] %v1436_v6   ;;  %v1928_v13 = vpop.f32.mrf.mxu1 }
 0x105   :  { %v1090_v15 = vadd.f32 %v1089_v11, %v1027_v8  ;;  %v957_v17 = vadd.f32 %v1585_v53, %v956_v10  ;;  %v1029_v22 = vmul.f32 %v432_v12, %v432_v12 }
 0x106   :  { %v1589_v18 = vpop.f32.mrf.mxu0  ;;  %v1930_v19 = vpop.f32.mrf.mxu1 }
 0x107   :  { %v958_v20 = vadd.f32 %v957_v17, %v432_v12  ;;  %v1091_v23 = vadd.f32 %v1090_v15, %v1028_v14  ;;  %v1371_v24 = vpack.c.bf16 %v1589_v18, %v1588_v5  ;;  %v1451_v27 = vpack.c.bf16 %v1930_v19, %v1920_v7 }
 0x108   :  { %v435_v25 = vpop.f32.mrf.mxu0  ;;  %v1934_v28 = vpop.f32.mrf.mxu1  ;;  %v1032_v46 = vmul.f32 %v1589_v18, %v1589_v18 }
 0x109   :  { %v1092_v29 = vadd.f32 %v1091_v23, %v1029_v22  ;;  %1491 = vst [vmem:[%s2126_s2 + $0x48] sm:$0xff] %v1371_v24   ;;  %v1366_v30 = vpack.c.bf16 %v435_v25, %v432_v12  ;;  %v959_v31 = vadd.f32 %v958_v20, %v435_v25  ;;  %v1030_v32 = vmul.f32 %v435_v25, %v435_v25 }
 0x10a   :  { %v1592_v34 = vpop.f32.mrf.mxu0  ;;  %1507 = vst [vmem:[%s2126_s2 + $0xc8] sm:$0xff] %v1451_v27   ;;  %v1446_v35 = vpack.c.bf16 %v1934_v28, %v1928_v13  ;;  %v1944_v36 = vpop.f32.mrf.mxu1 }
 0x10b   :  { %1490 = vst [vmem:[%s2126_s2 + $0x40] sm:$0xff] %v1366_v30   ;;  %v960_v38 = vadd.f32 %v1588_v5, %v959_v31  ;;  %v1093_v39 = vadd.f32 %v1092_v29, %v1030_v32  ;;  %v1035_v10 = vmul.f32 %v1592_v34, %v1592_v34 }
 0x10c   :  { %v448_v42 = vpop.f32.mrf.mxu0  ;;  %1506 = vst [vmem:[%s2126_s2 + $0xc0] sm:$0xff] %v1446_v35   ;;  %v1952_v44 = vpop.f32.mrf.mxu1 }
 0x10d   :  { %v1094_v47 = vadd.f32 %v1093_v39, %v1031_v37  ;;  %v961_v49 = vadd.f32 %v1589_v18, %v960_v38  ;;  %v1033_v55 = vmul.f32 %v448_v42, %v448_v42 }
 0x10e   :  { %v1593_v51 = vpop.f32.mrf.mxu0  ;;  %v1954_v52 = vpop.f32.mrf.mxu1 }
 0x10f   :  { %v962_v53 = vadd.f32 %v961_v49, %v448_v42  ;;  %v1095_v57 = vadd.f32 %v1094_v47, %v1032_v46  ;;  %v1381_v58 = vpack.c.bf16 %v1593_v51, %v1592_v34  ;;  %v1461_v60 = vpack.c.bf16 %v1954_v52, %v1944_v36 }
 0x110   :  { %v451_v59 = vpop.f32.mrf.mxu0  ;;  %v1958_v62 = vpop.f32.mrf.mxu1  ;;  %v1036_v17 = vmul.f32 %v1593_v51, %v1593_v51 }
 0x111   :  { %v1096_v0 = vadd.f32 %v1095_v57, %v1033_v55  ;;  %1493 = vst [vmem:[%s2126_s2 + $0x58] sm:$0xff] %v1381_v58   ;;  %v1376_v1 = vpack.c.bf16 %v451_v59, %v448_v42  ;;  %v963_v3 = vadd.f32 %v962_v53, %v451_v59  ;;  %v1034_v4 = vmul.f32 %v451_v59, %v451_v59 }
 0x112   :  { %v1596_v5 = vpop.f32.mrf.mxu0  ;;  %1509 = vst [vmem:[%s2126_s2 + $0xd8] sm:$0xff] %v1461_v60   ;;  %v1456_v6 = vpack.c.bf16 %v1958_v62, %v1952_v44  ;;  %v1968_v8 = vpop.f32.mrf.mxu1 }
 0x113   :  { %1492 = vst [vmem:[%s2126_s2 + $0x50] sm:$0xff] %v1376_v1   ;;  %v964_v11 = vadd.f32 %v1592_v34, %v963_v3  ;;  %v1097_v12 = vadd.f32 %v1096_v0, %v1034_v4  ;;  %v1039_v47 = vmul.f32 %v1596_v5, %v1596_v5 }
 0x114   :  { %v464_v14 = vpop.f32.mrf.mxu0  ;;  %1508 = vst [vmem:[%s2126_s2 + $0xd0] sm:$0xff] %v1456_v6   ;;  %v1976_v15 = vpop.f32.mrf.mxu1 }
 0x115   :  { %v1098_v18 = vadd.f32 %v1097_v12, %v1035_v10  ;;  %v965_v20 = vadd.f32 %v1593_v51, %v964_v11  ;;  %v1037_v25 = vmul.f32 %v464_v14, %v464_v14 }
 0x116   :  { %v1597_v22 = vpop.f32.mrf.mxu0  ;;  %v1978_v23 = vpop.f32.mrf.mxu1 }
 0x117   :  { %v966_v24 = vadd.f32 %v965_v20, %v464_v14  ;;  %v1099_v27 = vadd.f32 %v1098_v18, %v1036_v17  ;;  %v1391_v29 = vpack.c.bf16 %v1597_v22, %v1596_v5  ;;  %v1471_v31 = vpack.c.bf16 %v1978_v23, %v1968_v8 }
 0x118   :  { %v467_v30 = vpop.f32.mrf.mxu0  ;;  %v1982_v32 = vpop.f32.mrf.mxu1  ;;  %v1040_v57 = vmul.f32 %v1597_v22, %v1597_v22 }
 0x119   :  { %v1100_v34 = vadd.f32 %v1099_v27, %v1037_v25  ;;  %1495 = vst [vmem:[%s2126_s2 + $0x68] sm:$0xff] %v1391_v29   ;;  %v1386_v35 = vpack.c.bf16 %v467_v30, %v464_v14  ;;  %v967_v37 = vadd.f32 %v966_v24, %v467_v30  ;;  %v1038_v38 = vmul.f32 %v467_v30, %v467_v30 }
 0x11a   :  { %v1600_v39 = vpop.f32.mrf.mxu0  ;;  %1511 = vst [vmem:[%s2126_s2 + $0xe8] sm:$0xff] %v1471_v31   ;;  %v1466_v42 = vpack.c.bf16 %v1982_v32, %v1976_v15  ;;  %v1992_v46 = vpop.f32.mrf.mxu1  ;;  %v1045_v31 = vmul.f32 %v1832_v43, %v1832_v43 }
 0x11b   :  { %1494 = vst [vmem:[%s2126_s2 + $0x60] sm:$0xff] %v1386_v35   ;;  %v968_v49 = vadd.f32 %v1596_v5, %v967_v37  ;;  %v1101_v51 = vadd.f32 %v1100_v34, %v1038_v38  ;;  %v1046_v38 = vmul.f32 %v1838_v50, %v1838_v50 }
 0x11c   :  { %v480_v53 = vpop.f32.mrf.mxu0  ;;  %1510 = vst [vmem:[%s2126_s2 + $0xe0] sm:$0xff] %v1466_v42   ;;  %v2000_v55 = vpop.f32.mrf.mxu1  ;;  %v1047_v42 = vmul.f32 %v1830_v41, %v1830_v41 }
 0x11d   :  { %v1102_v58 = vadd.f32 %v1101_v51, %v1039_v47  ;;  %v969_v59 = vadd.f32 %v1597_v22, %v968_v49  ;;  %v1041_v3 = vmul.f32 %v480_v53, %v480_v53  ;;  %v1043_v22 = vmul.f32 %v1600_v39, %v1600_v39 }
 0x11e   :  { %v1601_v60 = vpop.f32.mrf.mxu0  ;;  %v2002_v0 = vpop.f32.mrf.mxu1  ;;  %v1048_v51 = vmul.f32 %v1834_v45, %v1834_v45 }
 0x11f   :  { %v970_v1 = vadd.f32 %v969_v59, %v480_v53  ;;  %v1103_v4 = vadd.f32 %v1102_v58, %v1040_v57  ;;  %v1401_v6 = vpack.c.bf16 %v1601_v60, %v1600_v39  ;;  %v1481_v5 = vpack.c.bf16 %v2002_v0, %v1992_v46 }
 0x120   :  { %v483_v10 = vpop.f32.mrf.mxu0  ;;  %v2006_v11 = vpop.f32.mrf.mxu1  ;;  %v1044_v27 = vmul.f32 %v1601_v60, %v1601_v60  ;;  %v1049_v58 = vmul.f32 %v1856_v61, %v1856_v61 }
 0x121   :  { %v1104_v12 = vadd.f32 %v1103_v4, %v1041_v3  ;;  %1497 = vst [vmem:[%s2126_s2 + $0x78] sm:$0xff] %v1401_v6   ;;  %v1396_v14 = vpack.c.bf16 %v483_v10, %v480_v53  ;;  %v971_v17 = vadd.f32 %v970_v1, %v483_v10  ;;  %v1042_v18 = vmul.f32 %v483_v10, %v483_v10 }
 0x122   :  { %1513 = vst [vmem:[%s2126_s2 + $0xf8] sm:$0xff] %v1481_v5   ;;  %v1476_v20 = vpack.c.bf16 %v2006_v11, %v2000_v55  ;;  %v1050_v1 = vmul.f32 %v1862_v9, %v1862_v9  ;;  %v1053_v5 = vmul.f32 %v1880_v21, %v1880_v21 }
 0x123   :  { %1496 = vst [vmem:[%s2126_s2 + $0x70] sm:$0xff] %v1396_v14   ;;  %v972_v24 = vadd.f32 %v1600_v39, %v971_v17  ;;  %v1105_v25 = vadd.f32 %v1104_v12, %v1042_v18  ;;  %v1054_v17 = vmul.f32 %v1886_v33, %v1886_v33 }
 0x124   :  { %1512 = vst [vmem:[%s2126_s2 + $0xf0] sm:$0xff] %v1476_v20  }
 0x125   :  { %v973_v29 = vadd.f32 %v1601_v60, %v972_v24  ;;  %v1106_v30 = vadd.f32 %v1105_v25, %v1043_v22  ;;  %v1057_v25 = vmul.f32 %v1904_v48, %v1904_v48 }
 0x127   :  { %v1107_v34 = vadd.f32 %v1106_v30, %v1044_v27  ;;  %v974_v35 = vadd.f32 %v973_v29, %v1832_v43  ;;  %v1058_v30 = vmul.f32 %v1910_v63, %v1910_v63 }
 0x129   :  { %v975_v37 = vadd.f32 %v974_v35, %v1838_v50  ;;  %v1108_v39 = vadd.f32 %v1107_v34, %v1045_v31 }
 0x12b   :  { %v976_v47 = vadd.f32 %v1830_v41, %v975_v37  ;;  %v1109_v49 = vadd.f32 %v1108_v39, %v1046_v38  ;;  %v1051_v41 = vmul.f32 %v1848_v56, %v1848_v56  ;;  %v1061_v38 = vmul.f32 %v1928_v13, %v1928_v13 }
 0x12d   :  { %v1110_v53 = vadd.f32 %v1109_v49, %v1047_v42  ;;  %v977_v57 = vadd.f32 %v1834_v45, %v976_v47  ;;  %v1052_v45 = vmul.f32 %v1858_v2, %v1858_v2  ;;  %v1062_v47 = vmul.f32 %v1934_v28, %v1934_v28 }
 0x12f   :  { %v978_v43 = vadd.f32 %v977_v57, %v1856_v61  ;;  %v1111_v59 = vadd.f32 %v1110_v53, %v1048_v51 }
 0x131   :  { %v1112_v50 = vadd.f32 %v1111_v59, %v1049_v58  ;;  %v979_v60 = vadd.f32 %v978_v43, %v1862_v9  ;;  %v1065_v43 = vmul.f32 %v1952_v44, %v1952_v44 }
 0x133   :  { %v980_v3 = vadd.f32 %v1848_v56, %v979_v60  ;;  %v1113_v4 = vadd.f32 %v1112_v50, %v1050_v1  ;;  %v1055_v56 = vmul.f32 %v1872_v16, %v1872_v16  ;;  %v1066_v50 = vmul.f32 %v1958_v62, %v1958_v62 }
 0x135   :  { %v1114_v6 = vadd.f32 %v1113_v4, %v1051_v41  ;;  %v981_v10 = vadd.f32 %v1858_v2, %v980_v3  ;;  %v1056_v2 = vmul.f32 %v1882_v26, %v1882_v26  ;;  %v1069_v4 = vmul.f32 %v1976_v15, %v1976_v15 }
 0x137   :  { %v982_v61 = vadd.f32 %v981_v10, %v1880_v21  ;;  %v1115_v12 = vadd.f32 %v1114_v6, %v1052_v45  ;;  %v1070_v10 = vmul.f32 %v1982_v32, %v1982_v32 }
 0x139   :  { %v1116_v14 = vadd.f32 %v1115_v12, %v1053_v5  ;;  %v983_v9 = vadd.f32 %v982_v61, %v1886_v33 }
 0x13b   :  { %v984_v18 = vadd.f32 %v1872_v16, %v983_v9  ;;  %v1117_v20 = vadd.f32 %v1116_v14, %v1054_v17  ;;  %v1059_v16 = vmul.f32 %v1896_v40, %v1896_v40  ;;  %v1073_v9 = vmul.f32 %v2000_v55, %v2000_v55 }
 0x13d   :  { %v1118_v22 = vadd.f32 %v1117_v20, %v1055_v56  ;;  %v985_v24 = vadd.f32 %v1882_v26, %v984_v18  ;;  %v1060_v26 = vmul.f32 %v1906_v54, %v1906_v54  ;;  %v1074_v18 = vmul.f32 %v2006_v11, %v2006_v11 }
 0x13f   :  { %v986_v21 = vadd.f32 %v985_v24, %v1904_v48  ;;  %v1119_v27 = vadd.f32 %v1118_v22, %v1056_v2 }
 0x141   :  { %v1120_v29 = vadd.f32 %v1119_v27, %v1057_v25  ;;  %v987_v33 = vadd.f32 %v986_v21, %v1910_v63 }
 0x143   :  { %v988_v31 = vadd.f32 %v1896_v40, %v987_v33  ;;  %v1121_v34 = vadd.f32 %v1120_v29, %v1058_v30  ;;  %v1063_v40 = vmul.f32 %v1920_v7, %v1920_v7 }
 0x145   :  { %v1122_v35 = vadd.f32 %v1121_v34, %v1059_v16  ;;  %v989_v37 = vadd.f32 %v1906_v54, %v988_v31  ;;  %v1064_v54 = vmul.f32 %v1930_v19, %v1930_v19 }
 0x147   :  { %v990_v48 = vadd.f32 %v989_v37, %v1928_v13  ;;  %v1123_v39 = vadd.f32 %v1122_v35, %v1060_v26 }
 0x149   :  { %v1124_v42 = vadd.f32 %v1123_v39, %v1061_v38  ;;  %v991_v63 = vadd.f32 %v990_v48, %v1934_v28 }
 0x14b   :  { %v992_v49 = vadd.f32 %v1920_v7, %v991_v63  ;;  %v1125_v51 = vadd.f32 %v1124_v42, %v1062_v47  ;;  %v1067_v7 = vmul.f32 %v1944_v36, %v1944_v36 }
 0x14d   :  { %v1126_v53 = vadd.f32 %v1125_v51, %v1063_v40  ;;  %v993_v57 = vadd.f32 %v1930_v19, %v992_v49  ;;  %v1068_v19 = vmul.f32 %v1954_v52, %v1954_v52 }
 0x14f   :  { %v994_v13 = vadd.f32 %v993_v57, %v1952_v44  ;;  %v1127_v58 = vadd.f32 %v1126_v53, %v1064_v54 }
 0x151   :  { %v1128_v59 = vadd.f32 %v1127_v58, %v1065_v43  ;;  %v995_v28 = vadd.f32 %v994_v13, %v1958_v62 }
 0x153   :  { %v996_v60 = vadd.f32 %v1944_v36, %v995_v28  ;;  %v1129_v1 = vadd.f32 %v1128_v59, %v1066_v50  ;;  %v1071_v36 = vmul.f32 %v1968_v8, %v1968_v8 }
 0x155   :  { %v1130_v41 = vadd.f32 %v1129_v1, %v1067_v7  ;;  %v997_v3 = vadd.f32 %v1954_v52, %v996_v60  ;;  %v1072_v52 = vmul.f32 %v1978_v23, %v1978_v23 }
 0x157   :  { %v998_v44 = vadd.f32 %v997_v3, %v1976_v15  ;;  %v1131_v45 = vadd.f32 %v1130_v41, %v1068_v19 }
 0x159   :  { %v1132_v6 = vadd.f32 %v1131_v45, %v1069_v4  ;;  %v999_v62 = vadd.f32 %v998_v44, %v1982_v32 }
 0x15b   :  { %v1000_v61 = vadd.f32 %v1968_v8, %v999_v62  ;;  %v1133_v5 = vadd.f32 %v1132_v6, %v1070_v10  ;;  %v1075_v8 = vmul.f32 %v1992_v46, %v1992_v46 }
 0x15d   :  { %v1134_v12 = vadd.f32 %v1133_v5, %v1071_v36  ;;  %v1001_v14 = vadd.f32 %v1978_v23, %v1000_v61  ;;  %v1076_v23 = vmul.f32 %v2002_v0, %v2002_v0 }
 0x15f   :  { %v1002_v15 = vadd.f32 %v1001_v14, %v2000_v55  ;;  %v1135_v17 = vadd.f32 %v1134_v12, %v1072_v52 }
 0x161   :  { %v1136_v56 = vadd.f32 %v1135_v17, %v1073_v9  ;;  %v1003_v32 = vadd.f32 %v1002_v15, %v2006_v11 }
 0x163   :  { %v1004_v20 = vadd.f32 %v1992_v46, %v1003_v32  ;;  %v1137_v2 = vadd.f32 %v1136_v56, %v1074_v18 }
 0x165   :  { %v1005_v22 = vadd.f32 %v2002_v0, %v1004_v20  ;;  %v1138_v24 = vadd.f32 %v1137_v2, %v1075_v8 }
 0x167   :  { %v1006_v55 = vrot.slane %v1005_v22, 4  ;;  %v1139_v21 = vadd.f32 %v1138_v24, %v1076_v23 }
 0x169   :  { %v1007_v25 = vadd.f32 %v1006_v55, %v1005_v22  ;;  %v1140_v27 = vrot.slane %v1139_v21, 4 }
 0x16b   :  { %v1008_v29 = vrot.slane %v1007_v25, 2  ;;  %v1141_v33 = vadd.f32 %v1140_v27, %v1139_v21 }
 0x16d   :  { %v1009_v30 = vadd.f32 %v1008_v29, %v1007_v25  ;;  %v1142_v11 = vrot.slane %v1141_v33, 2 }
 0x16f   :  { %v1010_v16 = vrot.slane %v1009_v30, 1  ;;  %v1143_v31 = vadd.f32 %v1142_v11, %v1141_v33 }
 0x171   :  { %v1011_v34 = vadd.f32 %v1010_v16, %v1009_v30  ;;  %v1144_v26 = vrot.slane %v1143_v31, 1 }
 0x173   :  { %1012 = vst [vmem:[%s2127_s3] sm:$0x1] %v1011_v34  ;;  %v1145_v46 = vadd.f32 %v1144_v26, %v1143_v31 }
 0x175   :  { %1146 = vst [vmem:[%s2127_s3 + $0x1] sm:$0x1] %v1145_v46 }

// kernel: residual_block_forward.9
= control target key start
LH: loop header
LB: loop body
LE: loop exit
PB: predicated region body
PF: predicated region fallthrough
CT: control target
= control target key end

     0   :  { %s1800_s0 = inlined_call_operand.vmem [shape: bf16[512,128], index: 0, kind: input, shape index: {}]   ;;  %s1801_s1 = inlined_call_operand.vmem [shape: bf16[512,128], index: 1, kind: input, shape index: {}]   ;;  %s1802_s2 = inlined_call_operand.vmem [shape: f32[1,128], index: 2, kind: input, shape index: {}]   ;;  %s1803_s3 = inlined_call_operand.vmem [shape: f32[1,128], index: 3, kind: input, shape index: {}]   ;;  %s1804_s4 = inlined_call_operand.vmem [shape: f32[1,128], index: 4, kind: input, shape index: {}]   ;;  %s1805_s5 = inlined_call_operand.vmem [shape: f32[1,128], index: 5, kind: input, shape index: {}]   ;;  %s1806_s6 = inlined_call_operand.vmem [shape: f32[512,128], index: 6, kind: output, shape index: {}]  }
   0x1   :  { %v764_v0 = vld [vmem:[%s1800_s0] sm:$0xff]   ;;  %v1019_v9 = vld [vmem:[%s1800_s0 + $0x8] sm:$0xff]   ;;  %v1020_v20 = vld [vmem:[%s1800_s0 + $0x10] sm:$0xff]  }
   0x2   :  { %v1126_v1 = vld [vmem:[%s1802_s2] ss:$0 sm:$0xff]  ;;  %v765_v2 = vunpack.c.l.bf16 %v764_v0  ;;  %v766_v5 = vunpack.c.h.bf16 %v764_v0  ;;  %v1050_v10 = vld [vmem:[%s1801_s1 + $0x8] sm:$0xff]   ;;  %v769_v14 = vunpack.c.l.bf16 %v1019_v9  ;;  %v770_v18 = vunpack.c.h.bf16 %v1019_v9  ;;  %v1051_v21 = vld [vmem:[%s1801_s1 + $0x10] sm:$0xff]  }
   0x3   :  { %v892_v3 = vld [vmem:[%s1801_s1] sm:$0xff]   ;;  %v897_v15 = vunpack.c.l.bf16 %v1050_v10  ;;  %v898_v19 = vunpack.c.h.bf16 %v1050_v10  ;;  %v773_v32 = vunpack.c.l.bf16 %v1020_v20  ;;  %v901_v33 = vunpack.c.l.bf16 %v1051_v21  ;;  %v1021_v42 = vld [vmem:[%s1800_s0 + $0x18] sm:$0xff]  }
   0x4   :  { %v1134_v4 = vld [vmem:[%s1804_s4] ss:$0 sm:$0xff]  ;;  %v893_v7 = vunpack.c.l.bf16 %v892_v3  ;;  %v894_v8 = vunpack.c.h.bf16 %v892_v3  ;;  %v158_v11 = vmul.f32 %v765_v2, %v1126_v1  ;;  %v159_v13 = vmul.f32 %v766_v5, %v1126_v1  ;;  %v1052_v43 = vld [vmem:[%s1801_s1 + $0x18] sm:$0xff]  }
   0x5   :  { %v1139_v6 = vld [vmem:[%s1803_s3] ss:$0 sm:$0xff]  ;;  %v160_v24 = vmul.f32 %v769_v14, %v1126_v1  ;;  %v430_v25 = vmul.f32 %v897_v15, %v1134_v4  ;;  %v161_v28 = vmul.f32 %v770_v18, %v1126_v1  ;;  %v431_v29 = vmul.f32 %v898_v19, %v1134_v4  ;;  %v1023_v14 = vld [vmem:[%s1800_s0 + $0x28] sm:$0xff]  }
   0x6   :  { %v1151_v12 = vld [vmem:[%s1805_s5] ss:$0 sm:$0xff]  ;;  %v428_v16 = vmul.f32 %v893_v7, %v1134_v4  ;;  %v429_v17 = vmul.f32 %v894_v8, %v1134_v4  ;;  %v229_v22 = vadd.f32 %v1139_v6, %v158_v11  ;;  %v230_v23 = vadd.f32 %v1139_v6, %v159_v13  ;;  %v1054_v19 = vld [vmem:[%s1801_s1 + $0x28] sm:$0xff]  }
   0x7   :  { %v231_v30 = vadd.f32 %v1139_v6, %v160_v24  ;;  %v501_v31 = vadd.f32 %v1151_v12, %v430_v25  ;;  %v232_v36 = vadd.f32 %v1139_v6, %v161_v28  ;;  %v502_v37 = vadd.f32 %v1151_v12, %v431_v29  ;;  %v1022_v52 = vld [vmem:[%s1800_s0 + $0x20] sm:$0xff]  }
   0x8   :  { %v499_v26 = vadd.f32 %v1151_v12, %v428_v16  ;;  %v500_v27 = vadd.f32 %v1151_v12, %v429_v17  ;;  %v162_v39 = vmul.f32 %v773_v32, %v1126_v1  ;;  %v432_v40 = vmul.f32 %v901_v33, %v1134_v4  ;;  %v1053_v57 = vld [vmem:[%s1801_s1 + $0x20] sm:$0xff]   ;;  %v1024_v32 = vld [vmem:[%s1800_s0 + $0x30] sm:$0xff]  }
   0x9   :  { %v565_v38 = vadd.f32 %v501_v31, %v231_v30  ;;  %v774_v41 = vunpack.c.h.bf16 %v1020_v20  ;;  %v566_v46 = vadd.f32 %v502_v37, %v232_v36  ;;  %v902_v47 = vunpack.c.h.bf16 %v1051_v21  ;;  %v1055_v33 = vld [vmem:[%s1801_s1 + $0x30] sm:$0xff]  }
   0xa   :  { %v563_v34 = vadd.f32 %v499_v26, %v229_v22  ;;  %v564_v35 = vadd.f32 %v500_v27, %v230_v23  ;;  %v233_v49 = vadd.f32 %v1139_v6, %v162_v39  ;;  %v503_v50 = vadd.f32 %v1151_v12, %v432_v40 }
   0xb   :  { %v629_v48 = vmax.f32 %v565_v38, 0.0  ;;  %v163_v51 = vmul.f32 %v774_v41, %v1126_v1  ;;  %v630_v53 = vmax.f32 %v566_v46, 0.0  ;;  %v433_v54 = vmul.f32 %v902_v47, %v1134_v4  ;;  %v1025_v46 = vld [vmem:[%s1800_s0 + $0x38] sm:$0xff]  }
   0xc   :  { %v627_v44 = vmax.f32 %v563_v34, 0.0  ;;  %v628_v45 = vmax.f32 %v564_v35, 0.0  ;;  %v777_v55 = vunpack.c.l.bf16 %v1021_v42  ;;  %v905_v56 = vunpack.c.l.bf16 %v1052_v43 }
   0xd   :  { %693 = vst [vmem:[%s1806_s6 + $0x10] sm:$0xff] %v629_v48  ;;  %v567_v58 = vadd.f32 %v503_v50, %v233_v49  ;;  %v234_v59 = vadd.f32 %v1139_v6, %v163_v51  ;;  %v778_v60 = vunpack.c.h.bf16 %v1021_v42  ;;  %v906_v61 = vunpack.c.h.bf16 %v1052_v43  ;;  %694 = vst [vmem:[%s1806_s6 + $0x18] sm:$0xff] %v630_v53 }
   0xe   :  { %691 = vst [vmem:[%s1806_s6] sm:$0xff] %v627_v44  ;;  %692 = vst [vmem:[%s1806_s6 + $0x8] sm:$0xff] %v628_v45  ;;  %v504_v62 = vadd.f32 %v1151_v12, %v433_v54  ;;  %v164_v63 = vmul.f32 %v777_v55, %v1126_v1  ;;  %v434_v0 = vmul.f32 %v905_v56, %v1134_v4  ;;  %v781_v2 = vunpack.c.l.bf16 %v1022_v52  ;;  %v1056_v55 = vld [vmem:[%s1801_s1 + $0x38] sm:$0xff]  }
   0xf   :  { %v631_v3 = vmax.f32 %v567_v58, 0.0  ;;  %v165_v5 = vmul.f32 %v778_v60, %v1126_v1  ;;  %v435_v7 = vmul.f32 %v906_v61, %v1134_v4  ;;  %v909_v8 = vunpack.c.l.bf16 %v1053_v57 }
  0x10   :  { %v568_v9 = vadd.f32 %v504_v62, %v234_v59  ;;  %v235_v10 = vadd.f32 %v1139_v6, %v164_v63  ;;  %v505_v11 = vadd.f32 %v1151_v12, %v434_v0  ;;  %v166_v13 = vmul.f32 %v781_v2, %v1126_v1 }
  0x11   :  { %695 = vst [vmem:[%s1806_s6 + $0x20] sm:$0xff] %v631_v3  ;;  %v236_v15 = vadd.f32 %v1139_v6, %v165_v5  ;;  %v506_v16 = vadd.f32 %v1151_v12, %v435_v7  ;;  %v436_v17 = vmul.f32 %v909_v8, %v1134_v4  ;;  %v782_v18 = vunpack.c.h.bf16 %v1022_v52  ;;  %v1026_v7 = vld [vmem:[%s1800_s0 + $0x40] sm:$0xff]  }
  0x12   :  { %v632_v20 = vmax.f32 %v568_v9, 0.0  ;;  %v569_v21 = vadd.f32 %v505_v11, %v235_v10  ;;  %v237_v22 = vadd.f32 %v1139_v6, %v166_v13  ;;  %v910_v23 = vunpack.c.h.bf16 %v1053_v57  ;;  %v1057_v13 = vld [vmem:[%s1801_s1 + $0x40] sm:$0xff]  }
  0x13   :  { %v570_v24 = vadd.f32 %v506_v16, %v236_v15  ;;  %v507_v25 = vadd.f32 %v1151_v12, %v436_v17  ;;  %v167_v26 = vmul.f32 %v782_v18, %v1126_v1  ;;  %v785_v27 = vunpack.c.l.bf16 %v1023_v14 }
  0x14   :  { %696 = vst [vmem:[%s1806_s6 + $0x28] sm:$0xff] %v632_v20  ;;  %v633_v28 = vmax.f32 %v569_v21, 0.0  ;;  %v437_v29 = vmul.f32 %v910_v23, %v1134_v4  ;;  %v913_v30 = vunpack.c.l.bf16 %v1054_v19  ;;  %v786_v31 = vunpack.c.h.bf16 %v1023_v14 }
  0x15   :  { %v634_v34 = vmax.f32 %v570_v24, 0.0  ;;  %v571_v35 = vadd.f32 %v507_v25, %v237_v22  ;;  %v238_v36 = vadd.f32 %v1139_v6, %v167_v26  ;;  %v168_v37 = vmul.f32 %v785_v27, %v1126_v1  ;;  %v1027_v26 = vld [vmem:[%s1800_s0 + $0x48] sm:$0xff]  }
  0x16   :  { %697 = vst [vmem:[%s1806_s6 + $0x30] sm:$0xff] %v633_v28  ;;  %v508_v38 = vadd.f32 %v1151_v12, %v437_v29  ;;  %v438_v39 = vmul.f32 %v913_v30, %v1134_v4  ;;  %v169_v40 = vmul.f32 %v786_v31, %v1126_v1  ;;  %v914_v41 = vunpack.c.h.bf16 %v1054_v19  ;;  %v1058_v27 = vld [vmem:[%s1801_s1 + $0x48] sm:$0xff]  }
  0x17   :  { %698 = vst [vmem:[%s1806_s6 + $0x38] sm:$0xff] %v634_v34  ;;  %v635_v42 = vmax.f32 %v571_v35, 0.0  ;;  %v239_v43 = vadd.f32 %v1139_v6, %v168_v37  ;;  %v789_v44 = vunpack.c.l.bf16 %v1024_v32  ;;  %v917_v45 = vunpack.c.l.bf16 %v1055_v33 }
  0x18   :  { %v572_v47 = vadd.f32 %v508_v38, %v238_v36  ;;  %v509_v48 = vadd.f32 %v1151_v12, %v438_v39  ;;  %v240_v49 = vadd.f32 %v1139_v6, %v169_v40  ;;  %v439_v50 = vmul.f32 %v914_v41, %v1134_v4  ;;  %v1028_v40 = vld [vmem:[%s1800_s0 + $0x50] sm:$0xff]  }
  0x19   :  { %699 = vst [vmem:[%s1806_s6 + $0x40] sm:$0xff] %v635_v42  ;;  %v170_v51 = vmul.f32 %v789_v44, %v1126_v1  ;;  %v440_v52 = vmul.f32 %v917_v45, %v1134_v4  ;;  %v790_v53 = vunpack.c.h.bf16 %v1024_v32  ;;  %v918_v54 = vunpack.c.h.bf16 %v1055_v33 }
  0x1a   :  { %v636_v56 = vmax.f32 %v572_v47, 0.0  ;;  %v573_v57 = vadd.f32 %v509_v48, %v239_v43  ;;  %v510_v58 = vadd.f32 %v1151_v12, %v439_v50  ;;  %v793_v59 = vunpack.c.l.bf16 %v1025_v46 }
  0x1b   :  { %v241_v60 = vadd.f32 %v1139_v6, %v170_v51  ;;  %v511_v61 = vadd.f32 %v1151_v12, %v440_v52  ;;  %v171_v62 = vmul.f32 %v790_v53, %v1126_v1  ;;  %v441_v63 = vmul.f32 %v918_v54, %v1134_v4 }
  0x1c   :  { %700 = vst [vmem:[%s1806_s6 + $0x48] sm:$0xff] %v636_v56  ;;  %v637_v0 = vmax.f32 %v573_v57, 0.0  ;;  %v574_v2 = vadd.f32 %v510_v58, %v240_v49  ;;  %v172_v3 = vmul.f32 %v793_v59, %v1126_v1  ;;  %v921_v5 = vunpack.c.l.bf16 %v1056_v55  ;;  %v1059_v49 = vld [vmem:[%s1801_s1 + $0x50] sm:$0xff]  }
  0x1d   :  { %v575_v8 = vadd.f32 %v511_v61, %v241_v60  ;;  %v242_v9 = vadd.f32 %v1139_v6, %v171_v62  ;;  %v512_v10 = vadd.f32 %v1151_v12, %v441_v63  ;;  %v794_v11 = vunpack.c.h.bf16 %v1025_v46  ;;  %v1029_v62 = vld [vmem:[%s1800_s0 + $0x58] sm:$0xff]  }
  0x1e   :  { %701 = vst [vmem:[%s1806_s6 + $0x50] sm:$0xff] %v637_v0  ;;  %v638_v14 = vmax.f32 %v574_v2, 0.0  ;;  %v243_v15 = vadd.f32 %v1139_v6, %v172_v3  ;;  %v442_v16 = vmul.f32 %v921_v5, %v1134_v4  ;;  %v922_v17 = vunpack.c.h.bf16 %v1056_v55  ;;  %v1060_v63 = vld [vmem:[%s1801_s1 + $0x58] sm:$0xff]  }
  0x1f   :  { %v639_v18 = vmax.f32 %v575_v8, 0.0  ;;  %v576_v19 = vadd.f32 %v512_v10, %v242_v9  ;;  %v173_v20 = vmul.f32 %v794_v11, %v1126_v1  ;;  %v797_v21 = vunpack.c.l.bf16 %v1026_v7 }
  0x20   :  { %702 = vst [vmem:[%s1806_s6 + $0x58] sm:$0xff] %v638_v14  ;;  %v513_v22 = vadd.f32 %v1151_v12, %v442_v16  ;;  %v443_v23 = vmul.f32 %v922_v17, %v1134_v4  ;;  %v925_v24 = vunpack.c.l.bf16 %v1057_v13  ;;  %v798_v25 = vunpack.c.h.bf16 %v1026_v7 }
  0x21   :  { %703 = vst [vmem:[%s1806_s6 + $0x60] sm:$0xff] %v639_v18  ;;  %v640_v28 = vmax.f32 %v576_v19, 0.0  ;;  %v244_v29 = vadd.f32 %v1139_v6, %v173_v20  ;;  %v174_v30 = vmul.f32 %v797_v21, %v1126_v1  ;;  %v926_v31 = vunpack.c.h.bf16 %v1057_v13  ;;  %v1030_v20 = vld [vmem:[%s1800_s0 + $0x60] sm:$0xff]  }
  0x22   :  { %v577_v32 = vadd.f32 %v513_v22, %v243_v15  ;;  %v514_v33 = vadd.f32 %v1151_v12, %v443_v23  ;;  %v444_v34 = vmul.f32 %v925_v24, %v1134_v4  ;;  %v175_v35 = vmul.f32 %v798_v25, %v1126_v1  ;;  %v1061_v25 = vld [vmem:[%s1801_s1 + $0x60] sm:$0xff]  }
  0x23   :  { %704 = vst [vmem:[%s1806_s6 + $0x68] sm:$0xff] %v640_v28  ;;  %v245_v36 = vadd.f32 %v1139_v6, %v174_v30  ;;  %v445_v37 = vmul.f32 %v926_v31, %v1134_v4  ;;  %v801_v38 = vunpack.c.l.bf16 %v1027_v26  ;;  %v929_v39 = vunpack.c.l.bf16 %v1058_v27 }
  0x24   :  { %v641_v41 = vmax.f32 %v577_v32, 0.0  ;;  %v578_v42 = vadd.f32 %v514_v33, %v244_v29  ;;  %v515_v43 = vadd.f32 %v1151_v12, %v444_v34  ;;  %v246_v44 = vadd.f32 %v1139_v6, %v175_v35  ;;  %v1031_v34 = vld [vmem:[%s1800_s0 + $0x68] sm:$0xff]  }
  0x25   :  { %v516_v45 = vadd.f32 %v1151_v12, %v445_v37  ;;  %v176_v46 = vmul.f32 %v801_v38, %v1126_v1  ;;  %v446_v47 = vmul.f32 %v929_v39, %v1134_v4  ;;  %v802_v48 = vunpack.c.h.bf16 %v1027_v26 }
  0x26   :  { %705 = vst [vmem:[%s1806_s6 + $0x70] sm:$0xff] %v641_v41  ;;  %v642_v50 = vmax.f32 %v578_v42, 0.0  ;;  %v579_v51 = vadd.f32 %v515_v43, %v245_v36  ;;  %v930_v52 = vunpack.c.h.bf16 %v1058_v27  ;;  %v805_v53 = vunpack.c.l.bf16 %v1028_v40  ;;  %v1062_v43 = vld [vmem:[%s1801_s1 + $0x68] sm:$0xff]  }
  0x27   :  { %v580_v54 = vadd.f32 %v516_v45, %v246_v44  ;;  %v247_v55 = vadd.f32 %v1139_v6, %v176_v46  ;;  %v517_v56 = vadd.f32 %v1151_v12, %v446_v47  ;;  %v177_v57 = vmul.f32 %v802_v48, %v1126_v1 }
  0x28   :  { %706 = vst [vmem:[%s1806_s6 + $0x78] sm:$0xff] %v642_v50  ;;  %v643_v58 = vmax.f32 %v579_v51, 0.0  ;;  %v447_v59 = vmul.f32 %v930_v52, %v1134_v4  ;;  %v178_v60 = vmul.f32 %v805_v53, %v1126_v1  ;;  %v933_v61 = vunpack.c.l.bf16 %v1059_v49 }
  0x29   :  { %v644_v0 = vmax.f32 %v580_v54, 0.0  ;;  %v581_v2 = vadd.f32 %v517_v56, %v247_v55  ;;  %v248_v3 = vadd.f32 %v1139_v6, %v177_v57  ;;  %v806_v5 = vunpack.c.h.bf16 %v1028_v40  ;;  %v1032_v56 = vld [vmem:[%s1800_s0 + $0x70] sm:$0xff]  }
  0x2a   :  { %707 = vst [vmem:[%s1806_s6 + $0x80] sm:$0xff] %v643_v58  ;;  %v518_v7 = vadd.f32 %v1151_v12, %v447_v59  ;;  %v249_v8 = vadd.f32 %v1139_v6, %v178_v60  ;;  %v448_v9 = vmul.f32 %v933_v61, %v1134_v4  ;;  %v934_v10 = vunpack.c.h.bf16 %v1059_v49  ;;  %v1063_v57 = vld [vmem:[%s1801_s1 + $0x70] sm:$0xff]  }
  0x2b   :  { %708 = vst [vmem:[%s1806_s6 + $0x88] sm:$0xff] %v644_v0  ;;  %v645_v11 = vmax.f32 %v581_v2, 0.0  ;;  %v179_v13 = vmul.f32 %v806_v5, %v1126_v1  ;;  %v809_v14 = vunpack.c.l.bf16 %v1029_v62  ;;  %v937_v15 = vunpack.c.l.bf16 %v1060_v63 }
  0x2c   :  { %v582_v16 = vadd.f32 %v518_v7, %v248_v3  ;;  %v519_v17 = vadd.f32 %v1151_v12, %v448_v9  ;;  %v449_v18 = vmul.f32 %v934_v10, %v1134_v4  ;;  %v810_v19 = vunpack.c.h.bf16 %v1029_v62 }
  0x2d   :  { %709 = vst [vmem:[%s1806_s6 + $0x90] sm:$0xff] %v645_v11  ;;  %v250_v21 = vadd.f32 %v1139_v6, %v179_v13  ;;  %v180_v22 = vmul.f32 %v809_v14, %v1126_v1  ;;  %v450_v23 = vmul.f32 %v937_v15, %v1134_v4  ;;  %v938_v24 = vunpack.c.h.bf16 %v1060_v63  ;;  %v1033_v14 = vld [vmem:[%s1800_s0 + $0x78] sm:$0xff]  }
  0x2e   :  { %v646_v26 = vmax.f32 %v582_v16, 0.0  ;;  %v583_v27 = vadd.f32 %v519_v17, %v249_v8  ;;  %v520_v28 = vadd.f32 %v1151_v12, %v449_v18  ;;  %v181_v29 = vmul.f32 %v810_v19, %v1126_v1  ;;  %v1064_v19 = vld [vmem:[%s1801_s1 + $0x78] sm:$0xff]  }
  0x2f   :  { %v251_v30 = vadd.f32 %v1139_v6, %v180_v22  ;;  %v521_v31 = vadd.f32 %v1151_v12, %v450_v23  ;;  %v451_v32 = vmul.f32 %v938_v24, %v1134_v4  ;;  %v813_v33 = vunpack.c.l.bf16 %v1030_v20 }
  0x30   :  { %710 = vst [vmem:[%s1806_s6 + $0x98] sm:$0xff] %v646_v26  ;;  %v647_v35 = vmax.f32 %v583_v27, 0.0  ;;  %v584_v36 = vadd.f32 %v520_v28, %v250_v21  ;;  %v252_v37 = vadd.f32 %v1139_v6, %v181_v29  ;;  %v941_v38 = vunpack.c.l.bf16 %v1061_v25  ;;  %v1034_v28 = vld [vmem:[%s1800_s0 + $0x80] sm:$0xff]  }
  0x31   :  { %v585_v39 = vadd.f32 %v521_v31, %v251_v30  ;;  %v522_v40 = vadd.f32 %v1151_v12, %v451_v32  ;;  %v182_v41 = vmul.f32 %v813_v33, %v1126_v1  ;;  %v814_v42 = vunpack.c.h.bf16 %v1030_v20  ;;  %v1065_v33 = vld [vmem:[%s1801_s1 + $0x80] sm:$0xff]  }
  0x32   :  { %711 = vst [vmem:[%s1806_s6 + $0xa0] sm:$0xff] %v647_v35  ;;  %v648_v44 = vmax.f32 %v584_v36, 0.0  ;;  %v452_v45 = vmul.f32 %v941_v38, %v1134_v4  ;;  %v942_v46 = vunpack.c.h.bf16 %v1061_v25  ;;  %v817_v47 = vunpack.c.l.bf16 %v1031_v34 }
  0x33   :  { %v649_v48 = vmax.f32 %v585_v39, 0.0  ;;  %v586_v49 = vadd.f32 %v522_v40, %v252_v37  ;;  %v253_v50 = vadd.f32 %v1139_v6, %v182_v41  ;;  %v183_v51 = vmul.f32 %v814_v42, %v1126_v1 }
  0x34   :  { %712 = vst [vmem:[%s1806_s6 + $0xa8] sm:$0xff] %v648_v44  ;;  %v523_v52 = vadd.f32 %v1151_v12, %v452_v45  ;;  %v453_v53 = vmul.f32 %v942_v46, %v1134_v4  ;;  %v184_v54 = vmul.f32 %v817_v47, %v1126_v1  ;;  %v945_v55 = vunpack.c.l.bf16 %v1062_v43 }
  0x35   :  { %713 = vst [vmem:[%s1806_s6 + $0xb0] sm:$0xff] %v649_v48  ;;  %v650_v58 = vmax.f32 %v586_v49, 0.0  ;;  %v254_v59 = vadd.f32 %v1139_v6, %v183_v51  ;;  %v818_v60 = vunpack.c.h.bf16 %v1031_v34  ;;  %v946_v61 = vunpack.c.h.bf16 %v1062_v43 }
  0x36   :  { %v587_v62 = vadd.f32 %v523_v52, %v253_v50  ;;  %v524_v63 = vadd.f32 %v1151_v12, %v453_v53  ;;  %v255_v0 = vadd.f32 %v1139_v6, %v184_v54  ;;  %v454_v2 = vmul.f32 %v945_v55, %v1134_v4  ;;  %v1035_v50 = vld [vmem:[%s1800_s0 + $0x88] sm:$0xff]  }
  0x37   :  { %714 = vst [vmem:[%s1806_s6 + $0xb8] sm:$0xff] %v650_v58  ;;  %v185_v3 = vmul.f32 %v818_v60, %v1126_v1  ;;  %v455_v5 = vmul.f32 %v946_v61, %v1134_v4  ;;  %v821_v7 = vunpack.c.l.bf16 %v1032_v56  ;;  %v949_v8 = vunpack.c.l.bf16 %v1063_v57  ;;  %v1066_v55 = vld [vmem:[%s1801_s1 + $0x88] sm:$0xff]  }
  0x38   :  { %v651_v9 = vmax.f32 %v587_v62, 0.0  ;;  %v588_v10 = vadd.f32 %v524_v63, %v254_v59  ;;  %v525_v11 = vadd.f32 %v1151_v12, %v454_v2  ;;  %v822_v13 = vunpack.c.h.bf16 %v1032_v56 }
  0x39   :  { %v256_v15 = vadd.f32 %v1139_v6, %v185_v3  ;;  %v526_v16 = vadd.f32 %v1151_v12, %v455_v5  ;;  %v186_v17 = vmul.f32 %v821_v7, %v1126_v1  ;;  %v456_v18 = vmul.f32 %v949_v8, %v1134_v4  ;;  %v1036_v7 = vld [vmem:[%s1800_s0 + $0x90] sm:$0xff]  }
  0x3a   :  { %715 = vst [vmem:[%s1806_s6 + $0xc0] sm:$0xff] %v651_v9  ;;  %v652_v20 = vmax.f32 %v588_v10, 0.0  ;;  %v589_v21 = vadd.f32 %v525_v11, %v255_v0  ;;  %v187_v22 = vmul.f32 %v822_v13, %v1126_v1  ;;  %v950_v23 = vunpack.c.h.bf16 %v1063_v57  ;;  %v1067_v13 = vld [vmem:[%s1801_s1 + $0x90] sm:$0xff]  }
  0x3b   :  { %v590_v24 = vadd.f32 %v526_v16, %v256_v15  ;;  %v257_v25 = vadd.f32 %v1139_v6, %v186_v17  ;;  %v527_v26 = vadd.f32 %v1151_v12, %v456_v18  ;;  %v825_v27 = vunpack.c.l.bf16 %v1033_v14 }
  0x3c   :  { %716 = vst [vmem:[%s1806_s6 + $0xc8] sm:$0xff] %v652_v20  ;;  %v653_v29 = vmax.f32 %v589_v21, 0.0  ;;  %v258_v30 = vadd.f32 %v1139_v6, %v187_v22  ;;  %v457_v31 = vmul.f32 %v950_v23, %v1134_v4  ;;  %v953_v32 = vunpack.c.l.bf16 %v1064_v19  ;;  %v1037_v22 = vld [vmem:[%s1800_s0 + $0x98] sm:$0xff]  }
  0x3d   :  { %v654_v34 = vmax.f32 %v590_v24, 0.0  ;;  %v591_v35 = vadd.f32 %v527_v26, %v257_v25  ;;  %v188_v36 = vmul.f32 %v825_v27, %v1126_v1  ;;  %v826_v37 = vunpack.c.h.bf16 %v1033_v14  ;;  %v1068_v27 = vld [vmem:[%s1801_s1 + $0x98] sm:$0xff]  }
  0x3e   :  { %717 = vst [vmem:[%s1806_s6 + $0xd0] sm:$0xff] %v653_v29  ;;  %v528_v38 = vadd.f32 %v1151_v12, %v457_v31  ;;  %v458_v39 = vmul.f32 %v953_v32, %v1134_v4  ;;  %v954_v40 = vunpack.c.h.bf16 %v1064_v19  ;;  %v829_v41 = vunpack.c.l.bf16 %v1034_v28 }
  0x3f   :  { %718 = vst [vmem:[%s1806_s6 + $0xd8] sm:$0xff] %v654_v34  ;;  %v655_v42 = vmax.f32 %v591_v35, 0.0  ;;  %v259_v43 = vadd.f32 %v1139_v6, %v188_v36  ;;  %v189_v44 = vmul.f32 %v826_v37, %v1126_v1  ;;  %v957_v45 = vunpack.c.l.bf16 %v1065_v33 }
  0x40   :  { %v592_v46 = vadd.f32 %v528_v38, %v258_v30  ;;  %v529_v47 = vadd.f32 %v1151_v12, %v458_v39  ;;  %v459_v48 = vmul.f32 %v954_v40, %v1134_v4  ;;  %v190_v49 = vmul.f32 %v829_v41, %v1126_v1 }
  0x41   :  { %719 = vst [vmem:[%s1806_s6 + $0xe0] sm:$0xff] %v655_v42  ;;  %v260_v51 = vadd.f32 %v1139_v6, %v189_v44  ;;  %v460_v52 = vmul.f32 %v957_v45, %v1134_v4  ;;  %v830_v53 = vunpack.c.h.bf16 %v1034_v28  ;;  %v958_v54 = vunpack.c.h.bf16 %v1065_v33  ;;  %v1038_v44 = vld [vmem:[%s1800_s0 + $0xa0] sm:$0xff]  }
  0x42   :  { %v656_v56 = vmax.f32 %v592_v46, 0.0  ;;  %v593_v57 = vadd.f32 %v529_v47, %v259_v43  ;;  %v530_v58 = vadd.f32 %v1151_v12, %v459_v48  ;;  %v261_v59 = vadd.f32 %v1139_v6, %v190_v49  ;;  %v1069_v49 = vld [vmem:[%s1801_s1 + $0xa0] sm:$0xff]  }
  0x43   :  { %v531_v60 = vadd.f32 %v1151_v12, %v460_v52  ;;  %v191_v61 = vmul.f32 %v830_v53, %v1126_v1  ;;  %v461_v62 = vmul.f32 %v958_v54, %v1134_v4  ;;  %v833_v63 = vunpack.c.l.bf16 %v1035_v50 }
  0x44   :  { %720 = vst [vmem:[%s1806_s6 + $0xe8] sm:$0xff] %v656_v56  ;;  %v657_v0 = vmax.f32 %v593_v57, 0.0  ;;  %v594_v2 = vadd.f32 %v530_v58, %v260_v51  ;;  %v961_v3 = vunpack.c.l.bf16 %v1066_v55  ;;  %v834_v5 = vunpack.c.h.bf16 %v1035_v50 }
  0x45   :  { %v595_v8 = vadd.f32 %v531_v60, %v261_v59  ;;  %v262_v9 = vadd.f32 %v1139_v6, %v191_v61  ;;  %v532_v10 = vadd.f32 %v1151_v12, %v461_v62  ;;  %v192_v11 = vmul.f32 %v833_v63, %v1126_v1  ;;  %v1039_v62 = vld [vmem:[%s1800_s0 + $0xa8] sm:$0xff]  }
  0x46   :  { %721 = vst [vmem:[%s1806_s6 + $0xf0] sm:$0xff] %v657_v0  ;;  %v658_v14 = vmax.f32 %v594_v2, 0.0  ;;  %v462_v15 = vmul.f32 %v961_v3, %v1134_v4  ;;  %v193_v16 = vmul.f32 %v834_v5, %v1126_v1  ;;  %v962_v17 = vunpack.c.h.bf16 %v1066_v55  ;;  %v1070_v63 = vld [vmem:[%s1801_s1 + $0xa8] sm:$0xff]  }
  0x47   :  { %v659_v18 = vmax.f32 %v595_v8, 0.0  ;;  %v596_v19 = vadd.f32 %v532_v10, %v262_v9  ;;  %v263_v20 = vadd.f32 %v1139_v6, %v192_v11  ;;  %v837_v21 = vunpack.c.l.bf16 %v1036_v7 }
  0x48   :  { %722 = vst [vmem:[%s1806_s6 + $0xf8] sm:$0xff] %v658_v14  ;;  %v533_v23 = vadd.f32 %v1151_v12, %v462_v15  ;;  %v264_v24 = vadd.f32 %v1139_v6, %v193_v16  ;;  %v463_v25 = vmul.f32 %v962_v17, %v1134_v4  ;;  %v965_v26 = vunpack.c.l.bf16 %v1067_v13  ;;  %v1040_v16 = vld [vmem:[%s1800_s0 + $0xb0] sm:$0xff]  }
  0x49   :  { %723 = vst [vmem:[%s1806_s6 + $0x100] sm:$0xff] %v659_v18  ;;  %v660_v28 = vmax.f32 %v596_v19, 0.0  ;;  %v194_v29 = vmul.f32 %v837_v21, %v1126_v1  ;;  %v838_v30 = vunpack.c.h.bf16 %v1036_v7  ;;  %v966_v31 = vunpack.c.h.bf16 %v1067_v13 }
  0x4a   :  { %v597_v32 = vadd.f32 %v533_v23, %v263_v20  ;;  %v534_v33 = vadd.f32 %v1151_v12, %v463_v25  ;;  %v464_v34 = vmul.f32 %v965_v26, %v1134_v4  ;;  %v841_v35 = vunpack.c.l.bf16 %v1037_v22  ;;  %v1071_v25 = vld [vmem:[%s1801_s1 + $0xb0] sm:$0xff]  }
  0x4b   :  { %724 = vst [vmem:[%s1806_s6 + $0x108] sm:$0xff] %v660_v28  ;;  %v265_v36 = vadd.f32 %v1139_v6, %v194_v29  ;;  %v195_v37 = vmul.f32 %v838_v30, %v1126_v1  ;;  %v465_v38 = vmul.f32 %v966_v31, %v1134_v4  ;;  %v969_v39 = vunpack.c.l.bf16 %v1068_v27 }
  0x4c   :  { %v661_v40 = vmax.f32 %v597_v32, 0.0  ;;  %v598_v41 = vadd.f32 %v534_v33, %v264_v24  ;;  %v535_v42 = vadd.f32 %v1151_v12, %v464_v34  ;;  %v196_v43 = vmul.f32 %v841_v35, %v1126_v1 }
  0x4d   :  { %v266_v45 = vadd.f32 %v1139_v6, %v195_v37  ;;  %v536_v46 = vadd.f32 %v1151_v12, %v465_v38  ;;  %v466_v47 = vmul.f32 %v969_v39, %v1134_v4  ;;  %v842_v48 = vunpack.c.h.bf16 %v1037_v22  ;;  %v1041_v38 = vld [vmem:[%s1800_s0 + $0xb8] sm:$0xff]  }
  0x4e   :  { %725 = vst [vmem:[%s1806_s6 + $0x110] sm:$0xff] %v661_v40  ;;  %v662_v50 = vmax.f32 %v598_v41, 0.0  ;;  %v599_v51 = vadd.f32 %v535_v42, %v265_v36  ;;  %v267_v52 = vadd.f32 %v1139_v6, %v196_v43  ;;  %v970_v53 = vunpack.c.h.bf16 %v1068_v27  ;;  %v1072_v43 = vld [vmem:[%s1801_s1 + $0xb8] sm:$0xff]  }
  0x4f   :  { %v600_v54 = vadd.f32 %v536_v46, %v266_v45  ;;  %v537_v55 = vadd.f32 %v1151_v12, %v466_v47  ;;  %v197_v56 = vmul.f32 %v842_v48, %v1126_v1  ;;  %v845_v57 = vunpack.c.l.bf16 %v1038_v44 }
  0x50   :  { %726 = vst [vmem:[%s1806_s6 + $0x118] sm:$0xff] %v662_v50  ;;  %v663_v58 = vmax.f32 %v599_v51, 0.0  ;;  %v467_v59 = vmul.f32 %v970_v53, %v1134_v4  ;;  %v973_v60 = vunpack.c.l.bf16 %v1069_v49  ;;  %v846_v61 = vunpack.c.h.bf16 %v1038_v44 }
  0x51   :  { %v664_v0 = vmax.f32 %v600_v54, 0.0  ;;  %v601_v2 = vadd.f32 %v537_v55, %v267_v52  ;;  %v268_v3 = vadd.f32 %v1139_v6, %v197_v56  ;;  %v198_v5 = vmul.f32 %v845_v57, %v1126_v1  ;;  %v1042_v56 = vld [vmem:[%s1800_s0 + $0xc0] sm:$0xff]  }
  0x52   :  { %727 = vst [vmem:[%s1806_s6 + $0x120] sm:$0xff] %v663_v58  ;;  %v538_v7 = vadd.f32 %v1151_v12, %v467_v59  ;;  %v468_v8 = vmul.f32 %v973_v60, %v1134_v4  ;;  %v199_v9 = vmul.f32 %v846_v61, %v1126_v1  ;;  %v974_v10 = vunpack.c.h.bf16 %v1069_v49  ;;  %v1073_v57 = vld [vmem:[%s1801_s1 + $0xc0] sm:$0xff]  }
  0x53   :  { %728 = vst [vmem:[%s1806_s6 + $0x128] sm:$0xff] %v664_v0  ;;  %v665_v11 = vmax.f32 %v601_v2, 0.0  ;;  %v269_v13 = vadd.f32 %v1139_v6, %v198_v5  ;;  %v849_v14 = vunpack.c.l.bf16 %v1039_v62  ;;  %v977_v15 = vunpack.c.l.bf16 %v1070_v63 }
  0x54   :  { %v602_v17 = vadd.f32 %v538_v7, %v268_v3  ;;  %v539_v18 = vadd.f32 %v1151_v12, %v468_v8  ;;  %v270_v19 = vadd.f32 %v1139_v6, %v199_v9  ;;  %v469_v20 = vmul.f32 %v974_v10, %v1134_v4  ;;  %v1043_v9 = vld [vmem:[%s1800_s0 + $0xc8] sm:$0xff]  }
  0x55   :  { %729 = vst [vmem:[%s1806_s6 + $0x130] sm:$0xff] %v665_v11  ;;  %v200_v21 = vmul.f32 %v849_v14, %v1126_v1  ;;  %v470_v22 = vmul.f32 %v977_v15, %v1134_v4  ;;  %v850_v23 = vunpack.c.h.bf16 %v1039_v62  ;;  %v978_v24 = vunpack.c.h.bf16 %v1070_v63 }
  0x56   :  { %v666_v26 = vmax.f32 %v602_v17, 0.0  ;;  %v603_v27 = vadd.f32 %v539_v18, %v269_v13  ;;  %v540_v28 = vadd.f32 %v1151_v12, %v469_v20  ;;  %v853_v29 = vunpack.c.l.bf16 %v1040_v16 }
  0x57   :  { %v271_v30 = vadd.f32 %v1139_v6, %v200_v21  ;;  %v541_v31 = vadd.f32 %v1151_v12, %v470_v22  ;;  %v201_v32 = vmul.f32 %v850_v23, %v1126_v1  ;;  %v471_v33 = vmul.f32 %v978_v24, %v1134_v4 }
  0x58   :  { %730 = vst [vmem:[%s1806_s6 + $0x138] sm:$0xff] %v666_v26  ;;  %v667_v34 = vmax.f32 %v603_v27, 0.0  ;;  %v604_v35 = vadd.f32 %v540_v28, %v270_v19  ;;  %v202_v36 = vmul.f32 %v853_v29, %v1126_v1  ;;  %v981_v37 = vunpack.c.l.bf16 %v1071_v25  ;;  %v1074_v19 = vld [vmem:[%s1801_s1 + $0xc8] sm:$0xff]  }
  0x59   :  { %v605_v39 = vadd.f32 %v541_v31, %v271_v30  ;;  %v272_v40 = vadd.f32 %v1139_v6, %v201_v32  ;;  %v542_v41 = vadd.f32 %v1151_v12, %v471_v33  ;;  %v854_v42 = vunpack.c.h.bf16 %v1040_v16  ;;  %v1044_v32 = vld [vmem:[%s1800_s0 + $0xd0] sm:$0xff]  }
  0x5a   :  { %731 = vst [vmem:[%s1806_s6 + $0x140] sm:$0xff] %v667_v34  ;;  %v668_v44 = vmax.f32 %v604_v35, 0.0  ;;  %v273_v45 = vadd.f32 %v1139_v6, %v202_v36  ;;  %v472_v46 = vmul.f32 %v981_v37, %v1134_v4  ;;  %v982_v47 = vunpack.c.h.bf16 %v1071_v25  ;;  %v1075_v33 = vld [vmem:[%s1801_s1 + $0xd0] sm:$0xff]  }
  0x5b   :  { %v669_v48 = vmax.f32 %v605_v39, 0.0  ;;  %v606_v49 = vadd.f32 %v542_v41, %v272_v40  ;;  %v203_v50 = vmul.f32 %v854_v42, %v1126_v1  ;;  %v857_v51 = vunpack.c.l.bf16 %v1041_v38 }
  0x5c   :  { %732 = vst [vmem:[%s1806_s6 + $0x148] sm:$0xff] %v668_v44  ;;  %v543_v52 = vadd.f32 %v1151_v12, %v472_v46  ;;  %v473_v53 = vmul.f32 %v982_v47, %v1134_v4  ;;  %v985_v54 = vunpack.c.l.bf16 %v1072_v43  ;;  %v858_v55 = vunpack.c.h.bf16 %v1041_v38 }
  0x5d   :  { %733 = vst [vmem:[%s1806_s6 + $0x150] sm:$0xff] %v669_v48  ;;  %v670_v58 = vmax.f32 %v606_v49, 0.0  ;;  %v274_v59 = vadd.f32 %v1139_v6, %v203_v50  ;;  %v204_v60 = vmul.f32 %v857_v51, %v1126_v1  ;;  %v986_v61 = vunpack.c.h.bf16 %v1072_v43  ;;  %v1654_v48 = vld [vmem:[%s1804_s4] ss:$0 sm:$0xff]  ;;  %v1045_v49 = vld [vmem:[%s1800_s0 + $0xd8] sm:$0xff]  }
  0x5e   :  { %v607_v62 = vadd.f32 %v543_v52, %v273_v45  ;;  %v544_v63 = vadd.f32 %v1151_v12, %v473_v53  ;;  %v474_v0 = vmul.f32 %v985_v54, %v1134_v4  ;;  %v205_v2 = vmul.f32 %v858_v55, %v1126_v1  ;;  %v1672_v50 = vld [vmem:[%s1802_s2] ss:$0 sm:$0xff]  ;;  %v1076_v54 = vld [vmem:[%s1801_s1 + $0xd8] sm:$0xff]  }
  0x5f   :  { %734 = vst [vmem:[%s1806_s6 + $0x158] sm:$0xff] %v670_v58  ;;  %v275_v3 = vadd.f32 %v1139_v6, %v204_v60  ;;  %v475_v5 = vmul.f32 %v986_v61, %v1134_v4  ;;  %v861_v7 = vunpack.c.l.bf16 %v1042_v56  ;;  %v989_v8 = vunpack.c.l.bf16 %v1073_v57 }
  0x60   :  { %v671_v10 = vmax.f32 %v607_v62, 0.0  ;;  %v608_v11 = vadd.f32 %v544_v63, %v274_v59  ;;  %v545_v13 = vadd.f32 %v1151_v12, %v474_v0  ;;  %v276_v14 = vadd.f32 %v1139_v6, %v205_v2  ;;  %v1046_v0 = vld [vmem:[%s1800_s0 + $0xe0] sm:$0xff]  }
  0x61   :  { %v546_v15 = vadd.f32 %v1151_v12, %v475_v5  ;;  %v206_v16 = vmul.f32 %v861_v7, %v1126_v1  ;;  %v476_v17 = vmul.f32 %v989_v8, %v1134_v4  ;;  %v862_v18 = vunpack.c.h.bf16 %v1042_v56 }
  0x62   :  { %735 = vst [vmem:[%s1806_s6 + $0x160] sm:$0xff] %v671_v10  ;;  %v672_v20 = vmax.f32 %v608_v11, 0.0  ;;  %v609_v21 = vadd.f32 %v545_v13, %v275_v3  ;;  %v990_v22 = vunpack.c.h.bf16 %v1073_v57  ;;  %v865_v23 = vunpack.c.l.bf16 %v1043_v9  ;;  %v1682_v57 = vld [vmem:[%s1805_s5] ss:$0 sm:$0xff] }
  0x63   :  { %v610_v24 = vadd.f32 %v546_v15, %v276_v14  ;;  %v277_v25 = vadd.f32 %v1139_v6, %v206_v16  ;;  %v547_v26 = vadd.f32 %v1151_v12, %v476_v17  ;;  %v207_v27 = vmul.f32 %v862_v18, %v1126_v1  ;;  %v1077_v13 = vld [vmem:[%s1801_s1 + $0xe0] sm:$0xff]  }
  0x64   :  { %736 = vst [vmem:[%s1806_s6 + $0x168] sm:$0xff] %v672_v20  ;;  %v673_v28 = vmax.f32 %v609_v21, 0.0  ;;  %v477_v29 = vmul.f32 %v990_v22, %v1134_v4  ;;  %v208_v30 = vmul.f32 %v865_v23, %v1126_v1  ;;  %v993_v31 = vunpack.c.l.bf16 %v1074_v19 }
  0x65   :  { %v674_v34 = vmax.f32 %v610_v24, 0.0  ;;  %v611_v35 = vadd.f32 %v547_v26, %v277_v25  ;;  %v278_v36 = vadd.f32 %v1139_v6, %v207_v27  ;;  %v866_v37 = vunpack.c.h.bf16 %v1043_v9  ;;  %v1047_v26 = vld [vmem:[%s1800_s0 + $0xe8] sm:$0xff]  }
  0x66   :  { %737 = vst [vmem:[%s1806_s6 + $0x170] sm:$0xff] %v673_v28  ;;  %v548_v38 = vadd.f32 %v1151_v12, %v477_v29  ;;  %v279_v39 = vadd.f32 %v1139_v6, %v208_v30  ;;  %v478_v40 = vmul.f32 %v993_v31, %v1134_v4  ;;  %v994_v41 = vunpack.c.h.bf16 %v1074_v19  ;;  %v1078_v27 = vld [vmem:[%s1801_s1 + $0xe8] sm:$0xff]  }
  0x67   :  { %738 = vst [vmem:[%s1806_s6 + $0x178] sm:$0xff] %v674_v34  ;;  %v675_v42 = vmax.f32 %v611_v35, 0.0  ;;  %v209_v43 = vmul.f32 %v866_v37, %v1126_v1  ;;  %v869_v44 = vunpack.c.l.bf16 %v1044_v32  ;;  %v997_v45 = vunpack.c.l.bf16 %v1075_v33  ;;  %v1666_v1 = vld [vmem:[%s1803_s3] ss:$0 sm:$0xff] }
  0x68   :  { %v612_v46 = vadd.f32 %v548_v38, %v278_v36  ;;  %v549_v47 = vadd.f32 %v1151_v12, %v478_v40  ;;  %v479_v4 = vmul.f32 %v1654_v48, %v994_v41  ;;  %v870_v6 = vunpack.c.h.bf16 %v1044_v32 }
  0x69   :  { %739 = vst [vmem:[%s1806_s6 + $0x180] sm:$0xff] %v675_v42  ;;  %v280_v12 = vadd.f32 %v1666_v1, %v209_v43  ;;  %v210_v51 = vmul.f32 %v1672_v50, %v869_v44  ;;  %v480_v52 = vmul.f32 %v1654_v48, %v997_v45  ;;  %v998_v53 = vunpack.c.h.bf16 %v1075_v33  ;;  %v1048_v44 = vld [vmem:[%s1800_s0 + $0xf0] sm:$0xff]  }
  0x6a   :  { %v676_v55 = vmax.f32 %v612_v46, 0.0  ;;  %v613_v56 = vadd.f32 %v549_v47, %v279_v39  ;;  %v550_v58 = vadd.f32 %v1682_v57, %v479_v4  ;;  %v211_v59 = vmul.f32 %v1672_v50, %v870_v6  ;;  %v1079_v6 = vld [vmem:[%s1801_s1 + $0xf0] sm:$0xff]  }
  0x6b   :  { %v281_v60 = vadd.f32 %v1666_v1, %v210_v51  ;;  %v551_v61 = vadd.f32 %v1682_v57, %v480_v52  ;;  %v481_v62 = vmul.f32 %v1654_v48, %v998_v53  ;;  %v873_v63 = vunpack.c.l.bf16 %v1045_v49 }
  0x6c   :  { %740 = vst [vmem:[%s1806_s6 + $0x188] sm:$0xff] %v676_v55  ;;  %v677_v2 = vmax.f32 %v613_v56, 0.0  ;;  %v614_v3 = vadd.f32 %v550_v58, %v280_v12  ;;  %v282_v5 = vadd.f32 %v1666_v1, %v211_v59  ;;  %v1001_v7 = vunpack.c.l.bf16 %v1076_v54  ;;  %v1049_v58 = vld [vmem:[%s1800_s0 + $0xf8] sm:$0xff]  }
  0x6d   :  { %v615_v8 = vadd.f32 %v551_v61, %v281_v60  ;;  %v552_v9 = vadd.f32 %v1682_v57, %v481_v62  ;;  %v212_v10 = vmul.f32 %v1672_v50, %v873_v63  ;;  %v874_v11 = vunpack.c.h.bf16 %v1045_v49  ;;  %v1080_v63 = vld [vmem:[%s1801_s1 + $0xf8] sm:$0xff]  }
  0x6e   :  { %741 = vst [vmem:[%s1806_s6 + $0x190] sm:$0xff] %v677_v2  ;;  %v678_v14 = vmax.f32 %v614_v3, 0.0  ;;  %v482_v15 = vmul.f32 %v1654_v48, %v1001_v7  ;;  %v1002_v16 = vunpack.c.h.bf16 %v1076_v54  ;;  %v877_v17 = vunpack.c.l.bf16 %v1046_v0 }
  0x6f   :  { %v679_v18 = vmax.f32 %v615_v8, 0.0  ;;  %v616_v19 = vadd.f32 %v552_v9, %v282_v5  ;;  %v283_v20 = vadd.f32 %v1666_v1, %v212_v10  ;;  %v213_v21 = vmul.f32 %v1672_v50, %v874_v11 }
  0x70   :  { %742 = vst [vmem:[%s1806_s6 + $0x198] sm:$0xff] %v678_v14  ;;  %v553_v22 = vadd.f32 %v1682_v57, %v482_v15  ;;  %v483_v23 = vmul.f32 %v1654_v48, %v1002_v16  ;;  %v214_v24 = vmul.f32 %v1672_v50, %v877_v17  ;;  %v1005_v25 = vunpack.c.l.bf16 %v1077_v13 }
  0x71   :  { %743 = vst [vmem:[%s1806_s6 + $0x1a0] sm:$0xff] %v679_v18  ;;  %v680_v28 = vmax.f32 %v616_v19, 0.0  ;;  %v284_v29 = vadd.f32 %v1666_v1, %v213_v21  ;;  %v878_v30 = vunpack.c.h.bf16 %v1046_v0  ;;  %v1006_v31 = vunpack.c.h.bf16 %v1077_v13 }
  0x72   :  { %v617_v32 = vadd.f32 %v553_v22, %v283_v20  ;;  %v554_v33 = vadd.f32 %v1682_v57, %v483_v23  ;;  %v285_v34 = vadd.f32 %v1666_v1, %v214_v24  ;;  %v484_v35 = vmul.f32 %v1654_v48, %v1005_v25 }
  0x73   :  { %744 = vst [vmem:[%s1806_s6 + $0x1a8] sm:$0xff] %v680_v28  ;;  %v215_v36 = vmul.f32 %v1672_v50, %v878_v30  ;;  %v485_v37 = vmul.f32 %v1654_v48, %v1006_v31  ;;  %v881_v38 = vunpack.c.l.bf16 %v1047_v26  ;;  %v1009_v39 = vunpack.c.l.bf16 %v1078_v27 }
  0x74   :  { %v681_v40 = vmax.f32 %v617_v32, 0.0  ;;  %v618_v41 = vadd.f32 %v554_v33, %v284_v29  ;;  %v555_v42 = vadd.f32 %v1682_v57, %v484_v35  ;;  %v882_v43 = vunpack.c.h.bf16 %v1047_v26 }
  0x75   :  { %v286_v45 = vadd.f32 %v1666_v1, %v215_v36  ;;  %v556_v46 = vadd.f32 %v1682_v57, %v485_v37  ;;  %v216_v47 = vmul.f32 %v1672_v50, %v881_v38  ;;  %v486_v4 = vmul.f32 %v1654_v48, %v1009_v39 }
  0x76   :  { %745 = vst [vmem:[%s1806_s6 + $0x1b0] sm:$0xff] %v681_v40  ;;  %v682_v49 = vmax.f32 %v618_v41, 0.0  ;;  %v619_v12 = vadd.f32 %v555_v42, %v285_v34  ;;  %v217_v51 = vmul.f32 %v1672_v50, %v882_v43  ;;  %v1010_v52 = vunpack.c.h.bf16 %v1078_v27 }
  0x77   :  { %v620_v53 = vadd.f32 %v556_v46, %v286_v45  ;;  %v287_v54 = vadd.f32 %v1666_v1, %v216_v47  ;;  %v557_v55 = vadd.f32 %v1682_v57, %v486_v4  ;;  %v885_v56 = vunpack.c.l.bf16 %v1048_v44 }
  0x78   :  { %746 = vst [vmem:[%s1806_s6 + $0x1b8] sm:$0xff] %v682_v49  ;;  %v683_v59 = vmax.f32 %v619_v12, 0.0  ;;  %v288_v60 = vadd.f32 %v1666_v1, %v217_v51  ;;  %v487_v61 = vmul.f32 %v1654_v48, %v1010_v52  ;;  %v1013_v62 = vunpack.c.l.bf16 %v1079_v6 }
  0x79   :  { %v684_v0 = vmax.f32 %v620_v53, 0.0  ;;  %v621_v2 = vadd.f32 %v557_v55, %v287_v54  ;;  %v218_v3 = vmul.f32 %v1672_v50, %v885_v56  ;;  %v886_v5 = vunpack.c.h.bf16 %v1048_v44 }
  0x7a   :  { %747 = vst [vmem:[%s1806_s6 + $0x1c0] sm:$0xff] %v683_v59  ;;  %v558_v7 = vadd.f32 %v1682_v57, %v487_v61  ;;  %v488_v8 = vmul.f32 %v1654_v48, %v1013_v62  ;;  %v1014_v9 = vunpack.c.h.bf16 %v1079_v6  ;;  %v889_v10 = vunpack.c.l.bf16 %v1049_v58 }
  0x7b   :  { %748 = vst [vmem:[%s1806_s6 + $0x1c8] sm:$0xff] %v684_v0  ;;  %v685_v11 = vmax.f32 %v621_v2, 0.0  ;;  %v289_v13 = vadd.f32 %v1666_v1, %v218_v3  ;;  %v219_v14 = vmul.f32 %v1672_v50, %v886_v5  ;;  %v1017_v15 = vunpack.c.l.bf16 %v1080_v63 }
  0x7c   :  { %v622_v16 = vadd.f32 %v558_v7, %v288_v60  ;;  %v559_v17 = vadd.f32 %v1682_v57, %v488_v8  ;;  %v489_v18 = vmul.f32 %v1654_v48, %v1014_v9  ;;  %v220_v19 = vmul.f32 %v1672_v50, %v889_v10 }
  0x7d   :  { %749 = vst [vmem:[%s1806_s6 + $0x1d0] sm:$0xff] %v685_v11  ;;  %v290_v20 = vadd.f32 %v1666_v1, %v219_v14  ;;  %v490_v21 = vmul.f32 %v1654_v48, %v1017_v15  ;;  %v890_v22 = vunpack.c.h.bf16 %v1049_v58  ;;  %v1018_v23 = vunpack.c.h.bf16 %v1080_v63 }
  0x7e   :  { %v686_v24 = vmax.f32 %v622_v16, 0.0  ;;  %v623_v25 = vadd.f32 %v559_v17, %v289_v13  ;;  %v560_v26 = vadd.f32 %v1682_v57, %v489_v18  ;;  %v291_v27 = vadd.f32 %v1666_v1, %v220_v19 }
  0x7f   :  { %v561_v28 = vadd.f32 %v1682_v57, %v490_v21  ;;  %v221_v29 = vmul.f32 %v1672_v50, %v890_v22  ;;  %v491_v30 = vmul.f32 %v1654_v48, %v1018_v23 }
  0x80   :  { %750 = vst [vmem:[%s1806_s6 + $0x1d8] sm:$0xff] %v686_v24  ;;  %v687_v31 = vmax.f32 %v623_v25, 0.0  ;;  %v624_v32 = vadd.f32 %v560_v26, %v290_v20 }
  0x81   :  { %v625_v33 = vadd.f32 %v561_v28, %v291_v27  ;;  %v292_v34 = vadd.f32 %v1666_v1, %v221_v29  ;;  %v562_v35 = vadd.f32 %v1682_v57, %v491_v30 }
  0x82   :  { %751 = vst [vmem:[%s1806_s6 + $0x1e0] sm:$0xff] %v687_v31  ;;  %v688_v36 = vmax.f32 %v624_v32, 0.0 }
  0x83   :  { %v689_v37 = vmax.f32 %v625_v33, 0.0  ;;  %v626_v50 = vadd.f32 %v562_v35, %v292_v34 }
  0x84   :  { %752 = vst [vmem:[%s1806_s6 + $0x1e8] sm:$0xff] %v688_v36 }
  0x85   :  { %753 = vst [vmem:[%s1806_s6 + $0x1f0] sm:$0xff] %v689_v37  ;;  %v690_v48 = vmax.f32 %v626_v50, 0.0 }
  0x87   :  { %754 = vst [vmem:[%s1806_s6 + $0x1f8] sm:$0xff] %v690_v48 }

</bundles_post_ra>
